<compile_context>
chip_gen: v7x
topology: tpu7x:2x2x1
jax: 0.10.0
libtpu: 0.0.40
codegen_flags: <defaults>
</compile_context>

<pallas_src>
import jax
import jax.numpy as jnp
from jax import lax
from jax.experimental import pallas as pl
from jax.experimental.pallas import tpu as pltpu


def _nninterp_kernel(x_ref, y_ref, d_ref, wt_ref, bias_ref, o_ref,
                     ya_ref, yb_ref):
    # x_ref   : (nb, Cx*H, W)        VMEM  x with (channel, row) merged
    # y_ref   : (nb, H, 4W)          VMEM  y with row pairs packed into lanes
    # d_ref   : (W, 2W)              VMEM  0/1 column-duplication matrix (resident)
    # wt_ref  : (27,)                SMEM  conv weight, idx = oc*9 + kh*3 + kw
    # bias_ref: (3,)                 SMEM
    # o_ref   : (nb, (Cx+3)*H, 4W)   VMEM  row-pair-flattened NCHW output
    # ya_ref  : (H+1, 2W+2)          VMEM scratch: even-index rows of padded y
    # yb_ref  : (H+1, 2W+2)          VMEM scratch: odd-index rows of padded y
    nb, cxh, w = x_ref.shape
    h = y_ref.shape[1]
    ow = 2 * w                    # conv / upsampled spatial width (2W)
    fw = 2 * ow                   # flattened lane width (4W)

    # ---------------- nearest 2x upsample: one MXU matmul ----------------
    # (nb*Cx*H, W) @ D(W, 2W) -> column-duplicated rows.  Flat output row
    # c*H+i packs output rows 2i and 2i+1 (identical), so the same result is
    # written to both lane halves.  precision=HIGHEST keeps the 0/1 selection
    # exact in f32.
    dmat = d_ref[...]
    if nb == 1 or cxh % 8 == 0:
        up = jnp.dot(x_ref[...].reshape(nb * cxh, w), dmat,
                     preferred_element_type=jnp.float32,
                     precision=jax.lax.Precision.HIGHEST)
        ups = [up[bi * cxh:(bi + 1) * cxh, :] for bi in range(nb)]
    else:  # avoid a sublane-repacking reshape when Cx*H is not 8-aligned
        ups = [jnp.dot(x_ref[bi], dmat,
                       preferred_element_type=jnp.float32,
                       precision=jax.lax.Precision.HIGHEST)
               for bi in range(nb)]
    for bi in range(nb):
        blk = ups[bi].astype(o_ref.dtype)
        o_ref[bi, 0:cxh, 0:ow] = blk          # output rows 2i
        o_ref[bi, 0:cxh, ow:fw] = blk         # output rows 2i+1 (identical)

    # ---------------- 3x3 conv, pad=1, 1 -> 3 channels --------------------
    # Zero-padded image ypad (2H+2, 2W+2) split by row parity:
    #   ya[t] = ypad[2t]   = y[2t-1] (t in [1,H]),  zeros at t=0
    #   yb[t] = ypad[2t+1] = y[2t]   (t in [0,H-1]), zeros at t=H
    # Only the halo needs zeroing; the interior is overwritten every step.
    ya_ref[0:1, :] = jnp.zeros((1, ow + 2), jnp.float32)
    yb_ref[h:h + 1, :] = jnp.zeros((1, ow + 2), jnp.float32)
    ya_ref[:, 0:1] = jnp.zeros((h + 1, 1), jnp.float32)
    ya_ref[:, ow + 1:ow + 2] = jnp.zeros((h + 1, 1), jnp.float32)
    yb_ref[:, 0:1] = jnp.zeros((h + 1, 1), jnp.float32)
    yb_ref[:, ow + 1:ow + 2] = jnp.zeros((h + 1, 1), jnp.float32)

    for bi in range(nb):
        ya_ref[1:h + 1, 1:ow + 1] = y_ref[bi, :, ow:fw]   # odd rows of y
        yb_ref[0:h, 1:ow + 1] = y_ref[bi, :, 0:ow]        # even rows of y

        # Tap-by-tap MAC loop: per kw load 4 shifted tiles, update all 6
        # accumulators (3 output channels x {even rows, odd rows}).
        acc_e = [None] * 3
        acc_o = [None] * 3
        for kw in range(3):
            a0 = ya_ref[0:h, kw:kw + ow]          # ypad[2i   , kw:kw+2W]
            b0 = yb_ref[0:h, kw:kw + ow]          # ypad[2i+1 , ...]
            a1 = ya_ref[1:h + 1, kw:kw + ow]      # ypad[2i+2 , ...]
            b1 = yb_ref[1:h + 1, kw:kw + ow]      # ypad[2i+3 , ...]
            for oc in range(3):
                w0 = wt_ref[oc * 9 + 0 * 3 + kw]  # w[oc, kh=0, kw]
                w1 = wt_ref[oc * 9 + 1 * 3 + kw]  # w[oc, kh=1, kw]
                w2 = wt_ref[oc * 9 + 2 * 3 + kw]  # w[oc, kh=2, kw]
                te = w0 * a0 + w1 * b0 + w2 * a1  # even output rows 2i
                to = w0 * b0 + w1 * a1 + w2 * b1  # odd  output rows 2i+1
                if kw == 0:
                    acc_e[oc] = te
                    acc_o[oc] = to
                else:
                    acc_e[oc] = acc_e[oc] + te
                    acc_o[oc] = acc_o[oc] + to

        for oc in range(3):
            row0 = cxh + oc * h
            # Flat row i of conv channel oc = [out[2i, :], out[2i+1, :]].
            o_ref[bi, row0:row0 + h, 0:ow] = (
                acc_e[oc] + bias_ref[oc]).astype(o_ref.dtype)
            o_ref[bi, row0:row0 + h, ow:fw] = (
                acc_o[oc] + bias_ref[oc]).astype(o_ref.dtype)


def _pick_batch_block(n, cxh):
    """Largest divisor of n (capped at 8) so the matmul M dim reaches ~256."""
    target = min(8, max(1, -(-256 // max(cxh, 1))))
    best = 1
    for cand in range(1, min(n, target) + 1):
        if n % cand == 0:
            best = cand
    return best


def nninterp_forward(x, y, conv_w, conv_b):
    """x: (N,Cx,H,W) f32; y: (N,1,2H,2W) f32; conv_w: (3,1,3,3); conv_b: (3,)."""
    n, cx, h, w = x.shape
    oh, ow = 2 * h, 2 * w
    fw = 2 * ow
    assert y.shape == (n, 1, oh, ow)
    cxh = cx * h
    nb = _pick_batch_block(n, cxh)

    # Free, byte-identical host-side views (no extra HBM traffic).
    x2 = x.reshape(n, cxh, w)                         # merge (channel, row)
    y2 = y.reshape(n, h, fw)                          # pack row pairs into lanes
    w_flat = conv_w.reshape(-1).astype(jnp.float32)   # (27,) SMEM scalars
    b_flat = conv_b.astype(jnp.float32)               # (3,)

    # Column-duplication matrix D[k, j] = (j // 2 == k); built once, kept
    # resident in VMEM (constant index_map -> never re-DMA'd).
    d = (jnp.arange(ow, dtype=jnp.int32)[None, :] // 2
         == jnp.arange(w, dtype=jnp.int32)[:, None]).astype(jnp.float32)

    # VMEM residency estimate (double-buffered blocks + scratch + main temps).
    blk_elems = (2 * nb * cxh * w + 2 * nb * h * fw + 2 * nb * (cx + 3) * h * fw
                 + 2 * w * ow + 2 * (h + 1) * (ow + 2)
                 + nb * cxh * ow + 10 * h * ow)
    vmem_limit = int(min(64 * 1024 * 1024,
                         max(32 * 1024 * 1024, 2 * 4 * blk_elems)))

    out_flat = pl.pallas_call(
        _nninterp_kernel,
        out_shape=jax.ShapeDtypeStruct((n, (cx + 3) * h, fw), jnp.float32),
        grid=(n // nb,),
        in_specs=[
            pl.BlockSpec((nb, cxh, w), lambda b: (b, 0, 0)),
            pl.BlockSpec((nb, h, fw), lambda b: (b, 0, 0)),
            pl.BlockSpec((w, ow), lambda b: (0, 0)),   # constant -> resident
            pl.BlockSpec(memory_space=pltpu.MemorySpace.SMEM),
            pl.BlockSpec(memory_space=pltpu.MemorySpace.SMEM),
        ],
        out_specs=pl.BlockSpec((nb, (cx + 3) * h, fw), lambda b: (b, 0, 0)),
        scratch_shapes=[
            pltpu.VMEM((h + 1, ow + 2), jnp.float32),   # even-index padded rows
            pltpu.VMEM((h + 1, ow + 2), jnp.float32),   # odd-index padded rows
        ],
        compiler_params=pltpu.CompilerParams(
            dimension_semantics=("parallel",),
            vmem_limit_bytes=vmem_limit,
        ),
    )(x2, y2, d, w_flat, b_flat)

    # Byte-identical reshape back to NCHW concat layout.
    return out_flat.reshape(n, cx + 3, oh, ow)


def _reference(x, y, conv_w, conv_b):
    """Pure-f32 elementwise reference (no MXU precision ambiguity)."""
    up = jnp.repeat(jnp.repeat(x, 2, axis=2), 2, axis=3)
    n = y.shape[0]
    oh, ow = y.shape[2], y.shape[3]
    yp = jnp.pad(y[:, 0], ((0, 0), (1, 1), (1, 1)))
    chans = []
    for oc in range(3):
        acc = jnp.full((n, oh, ow), conv_b[oc], dtype=jnp.float32)
        for kh in range(3):
            for kw in range(3):
                acc = acc + conv_w[oc, 0, kh, kw] * yp[:, kh:kh + oh, kw:kw + ow]
        chans.append(acc)
    conv = jnp.stack(chans, axis=1)
    return jnp.concatenate([up, conv], axis=1)


if __name__ == "__main__":
    key = jax.random.PRNGKey(0)
    kx, ky, kwt, kb = jax.random.split(key, 4)

    N, Cx, H, W = 2, 4, 8, 8            # x spatial 8x8 -> upsampled / y 16x16
    x = jax.random.normal(kx, (N, Cx, H, W), dtype=jnp.float32)
    y = jax.random.normal(ky, (N, 1, 2 * H, 2 * W), dtype=jnp.float32)

    # Deterministic synthetic Conv2d(1, 3, 3, stride=1, pad=1) parameters.
    conv_w = 0.1 * jax.random.normal(kwt, (3, 1, 3, 3), dtype=jnp.float32)
    conv_b = 0.1 * jax.random.normal(kb, (3,), dtype=jnp.float32)

    out = nninterp_forward(x, y, conv_w, conv_b)
    out = jax.block_until_ready(out)

    ref = _reference(x, y, conv_w, conv_b)
    assert out.shape == (N, Cx + 3, 2 * H, 2 * W), out.shape
    err = float(jnp.abs(out - ref).max())
    assert jnp.allclose(out, ref, atol=1e-5, rtol=1e-5), err

    print("KERNEL_OK")
</pallas_src>

<mosaic_0001>
module attributes {stable_mosaic.version = 11 : i64} {
  func.func @_nninterp_kernel(%arg0: i32, %arg1: memref<2x32x8xf32, #tpu.memory_space<vmem>>, %arg2: memref<2x8x32xf32, #tpu.memory_space<vmem>>, %arg3: memref<8x16xf32, #tpu.memory_space<vmem>>, %arg4: memref<27xf32, #tpu.memory_space<smem>>, %arg5: memref<3xf32, #tpu.memory_space<smem>>, %arg6: memref<2x56x32xf32, #tpu.memory_space<vmem>>, %arg7: memref<9x18xf32, #tpu.memory_space<vmem>>, %arg8: memref<9x18xf32, #tpu.memory_space<vmem>>) attributes {dimension_semantics = [#tpu.dimension_semantics<parallel>], iteration_bounds = array<i64: 1>, scalar_prefetch = 0 : i64, scratch_operands = 2 : i64, tpu.core_type = #tpu.core_type<tc>, window_params = [{transform_indices = @transform_0, window_bounds = array<i64: 2, 32, 8>}, {transform_indices = @transform_1, window_bounds = array<i64: 2, 8, 32>}, {pipeline_mode = #tpu.pipeline_mode<synchronous>, transform_indices = @transform_2, window_bounds = array<i64: 8, 16>}, {transform_indices = @transform_3, window_bounds = array<i64: 27>}, {transform_indices = @transform_4, window_bounds = array<i64: 3>}, {transform_indices = @transform_5, window_bounds = array<i64: 2, 56, 32>}]} {
    %c0 = arith.constant 0 : index
    %c0_0 = arith.constant 0 : index
    %0 = vector.load %arg3[%c0, %c0_0] : memref<8x16xf32, #tpu.memory_space<vmem>>, vector<8x16xf32>
    %c0_1 = arith.constant 0 : index
    %c0_2 = arith.constant 0 : index
    %c0_3 = arith.constant 0 : index
    %1 = vector.load %arg1[%c0_1, %c0_2, %c0_3] : memref<2x32x8xf32, #tpu.memory_space<vmem>>, vector<2x32x8xf32>
    %2 = vector.shape_cast %1 : vector<2x32x8xf32> to vector<64x8xf32>
    %cst = arith.constant dense<0.000000e+00> : vector<64x16xf32>
    %3 = tpu.matmul %2, %0, %cst {dimension_numbers = #tpu.dot_dimension_numbers<[1], [0], [0], [1], [0, 0, 1, 1], [], []>, precision = #tpu.contract_precision<fp32>} : vector<64x8xf32>, vector<8x16xf32>, vector<64x16xf32> -> vector<64x16xf32>
    %4 = vector.extract_strided_slice %3 {offsets = [0, 0], sizes = [32, 16], strides = [1, 1]} : vector<64x16xf32> to vector<32x16xf32>
    %5 = vector.extract_strided_slice %3 {offsets = [32, 0], sizes = [32, 16], strides = [1, 1]} : vector<64x16xf32> to vector<32x16xf32>
    %c0_4 = arith.constant 0 : index
    %c0_5 = arith.constant 0 : index
    %c0_6 = arith.constant 0 : index
    %6 = vector.load %arg6[%c0_4, %c0_5, %c0_6] : memref<2x56x32xf32, #tpu.memory_space<vmem>>, vector<1x32x16xf32>
    %7 = vector.shape_cast %6 : vector<1x32x16xf32> to vector<32x16xf32>
    %8 = vector.shape_cast %4 : vector<32x16xf32> to vector<1x32x16xf32>
    tpu.vector_store %arg6[%c0_4, %c0_5, %c0_6], %8 {strides = array<i32>} : memref<2x56x32xf32, #tpu.memory_space<vmem>>, vector<1x32x16xf32>,
    %c0_7 = arith.constant 0 : index
    %c0_8 = arith.constant 0 : index
    %c16 = arith.constant 16 : index
    %9 = vector.load %arg6[%c0_7, %c0_8, %c16] : memref<2x56x32xf32, #tpu.memory_space<vmem>>, vector<1x32x16xf32>
    %10 = vector.shape_cast %9 : vector<1x32x16xf32> to vector<32x16xf32>
    %11 = vector.shape_cast %4 : vector<32x16xf32> to vector<1x32x16xf32>
    tpu.vector_store %arg6[%c0_7, %c0_8, %c16], %11 {strides = array<i32>} : memref<2x56x32xf32, #tpu.memory_space<vmem>>, vector<1x32x16xf32>,
    %c1 = arith.constant 1 : index
    %c0_9 = arith.constant 0 : index
    %c0_10 = arith.constant 0 : index
    %12 = vector.load %arg6[%c1, %c0_9, %c0_10] : memref<2x56x32xf32, #tpu.memory_space<vmem>>, vector<1x32x16xf32>
    %13 = vector.shape_cast %12 : vector<1x32x16xf32> to vector<32x16xf32>
    %14 = vector.shape_cast %5 : vector<32x16xf32> to vector<1x32x16xf32>
    tpu.vector_store %arg6[%c1, %c0_9, %c0_10], %14 {strides = array<i32>} : memref<2x56x32xf32, #tpu.memory_space<vmem>>, vector<1x32x16xf32>,
    %c1_11 = arith.constant 1 : index
    %c0_12 = arith.constant 0 : index
    %c16_13 = arith.constant 16 : index
    %15 = vector.load %arg6[%c1_11, %c0_12, %c16_13] : memref<2x56x32xf32, #tpu.memory_space<vmem>>, vector<1x32x16xf32>
    %16 = vector.shape_cast %15 : vector<1x32x16xf32> to vector<32x16xf32>
    %17 = vector.shape_cast %5 : vector<32x16xf32> to vector<1x32x16xf32>
    tpu.vector_store %arg6[%c1_11, %c0_12, %c16_13], %17 {strides = array<i32>} : memref<2x56x32xf32, #tpu.memory_space<vmem>>, vector<1x32x16xf32>,
    %cst_14 = arith.constant 0.000000e+00 : f32
    %18 = vector.broadcast %cst_14 : f32 to vector<1x18xf32>
    %c0_15 = arith.constant 0 : index
    %c0_16 = arith.constant 0 : index
    %19 = vector.load %arg7[%c0_15, %c0_16] : memref<9x18xf32, #tpu.memory_space<vmem>>, vector<1x18xf32>
    tpu.vector_store %arg7[%c0_15, %c0_16], %18 {strides = array<i32>} : memref<9x18xf32, #tpu.memory_space<vmem>>, vector<1x18xf32>,
    %cst_17 = arith.constant 0.000000e+00 : f32
    %20 = vector.broadcast %cst_17 : f32 to vector<1x18xf32>
    %c8 = arith.constant 8 : index
    %c0_18 = arith.constant 0 : index
    %21 = vector.load %arg8[%c8, %c0_18] : memref<9x18xf32, #tpu.memory_space<vmem>>, vector<1x18xf32>
    tpu.vector_store %arg8[%c8, %c0_18], %20 {strides = array<i32>} : memref<9x18xf32, #tpu.memory_space<vmem>>, vector<1x18xf32>,
    %cst_19 = arith.constant 0.000000e+00 : f32
    %22 = vector.broadcast %cst_19 : f32 to vector<9x1xf32>
    %c0_20 = arith.constant 0 : index
    %c0_21 = arith.constant 0 : index
    %23 = vector.load %arg7[%c0_20, %c0_21] : memref<9x18xf32, #tpu.memory_space<vmem>>, vector<9x1xf32>
    tpu.vector_store %arg7[%c0_20, %c0_21], %22 {strides = array<i32>} : memref<9x18xf32, #tpu.memory_space<vmem>>, vector<9x1xf32>,
    %cst_22 = arith.constant 0.000000e+00 : f32
    %24 = vector.broadcast %cst_22 : f32 to vector<9x1xf32>
    %c0_23 = arith.constant 0 : index
    %c17 = arith.constant 17 : index
    %25 = vector.load %arg7[%c0_23, %c17] : memref<9x18xf32, #tpu.memory_space<vmem>>, vector<9x1xf32>
    tpu.vector_store %arg7[%c0_23, %c17], %24 {strides = array<i32>} : memref<9x18xf32, #tpu.memory_space<vmem>>, vector<9x1xf32>,
    %cst_24 = arith.constant 0.000000e+00 : f32
    %26 = vector.broadcast %cst_24 : f32 to vector<9x1xf32>
    %c0_25 = arith.constant 0 : index
    %c0_26 = arith.constant 0 : index
    %27 = vector.load %arg8[%c0_25, %c0_26] : memref<9x18xf32, #tpu.memory_space<vmem>>, vector<9x1xf32>
    tpu.vector_store %arg8[%c0_25, %c0_26], %26 {strides = array<i32>} : memref<9x18xf32, #tpu.memory_space<vmem>>, vector<9x1xf32>,
    %cst_27 = arith.constant 0.000000e+00 : f32
    %28 = vector.broadcast %cst_27 : f32 to vector<9x1xf32>
    %c0_28 = arith.constant 0 : index
    %c17_29 = arith.constant 17 : index
    %29 = vector.load %arg8[%c0_28, %c17_29] : memref<9x18xf32, #tpu.memory_space<vmem>>, vector<9x1xf32>
    tpu.vector_store %arg8[%c0_28, %c17_29], %28 {strides = array<i32>} : memref<9x18xf32, #tpu.memory_space<vmem>>, vector<9x1xf32>,
    %c0_30 = arith.constant 0 : index
    %c0_31 = arith.constant 0 : index
    %c16_32 = arith.constant 16 : index
    %30 = vector.load %arg2[%c0_30, %c0_31, %c16_32] : memref<2x8x32xf32, #tpu.memory_space<vmem>>, vector<1x8x16xf32>
    %31 = vector.shape_cast %30 : vector<1x8x16xf32> to vector<8x16xf32>
    %c1_33 = arith.constant 1 : index
    %c1_34 = arith.constant 1 : index
    %32 = vector.load %arg7[%c1_33, %c1_34] : memref<9x18xf32, #tpu.memory_space<vmem>>, vector<8x16xf32>
    tpu.vector_store %arg7[%c1_33, %c1_34], %31 {strides = array<i32>} : memref<9x18xf32, #tpu.memory_space<vmem>>, vector<8x16xf32>,
    %c0_35 = arith.constant 0 : index
    %c0_36 = arith.constant 0 : index
    %c0_37 = arith.constant 0 : index
    %33 = vector.load %arg2[%c0_35, %c0_36, %c0_37] : memref<2x8x32xf32, #tpu.memory_space<vmem>>, vector<1x8x16xf32>
    %34 = vector.shape_cast %33 : vector<1x8x16xf32> to vector<8x16xf32>
    %c0_38 = arith.constant 0 : index
    %c1_39 = arith.constant 1 : index
    %35 = vector.load %arg8[%c0_38, %c1_39] : memref<9x18xf32, #tpu.memory_space<vmem>>, vector<8x16xf32>
    tpu.vector_store %arg8[%c0_38, %c1_39], %34 {strides = array<i32>} : memref<9x18xf32, #tpu.memory_space<vmem>>, vector<8x16xf32>,
    %c0_40 = arith.constant 0 : index
    %c0_41 = arith.constant 0 : index
    %36 = vector.load %arg7[%c0_40, %c0_41] : memref<9x18xf32, #tpu.memory_space<vmem>>, vector<8x16xf32>
    %c0_42 = arith.constant 0 : index
    %c0_43 = arith.constant 0 : index
    %37 = vector.load %arg8[%c0_42, %c0_43] : memref<9x18xf32, #tpu.memory_space<vmem>>, vector<8x16xf32>
    %c1_44 = arith.constant 1 : index
    %c0_45 = arith.constant 0 : index
    %38 = vector.load %arg7[%c1_44, %c0_45] : memref<9x18xf32, #tpu.memory_space<vmem>>, vector<8x16xf32>
    %c1_46 = arith.constant 1 : index
    %c0_47 = arith.constant 0 : index
    %39 = vector.load %arg8[%c1_46, %c0_47] : memref<9x18xf32, #tpu.memory_space<vmem>>, vector<8x16xf32>
    %c0_48 = arith.constant 0 : index
    %40 = memref.load %arg4[%c0_48] : memref<27xf32, #tpu.memory_space<smem>>
    %c3 = arith.constant 3 : index
    %41 = memref.load %arg4[%c3] : memref<27xf32, #tpu.memory_space<smem>>
    %c6 = arith.constant 6 : index
    %42 = memref.load %arg4[%c6] : memref<27xf32, #tpu.memory_space<smem>>
    %43 = vector.broadcast %40 : f32 to vector<8x16xf32>
    %44 = arith.mulf %43, %36 : vector<8x16xf32>
    %45 = vector.broadcast %41 : f32 to vector<8x16xf32>
    %46 = arith.mulf %45, %37 : vector<8x16xf32>
    %47 = arith.addf %44, %46 : vector<8x16xf32>
    %48 = vector.broadcast %42 : f32 to vector<8x16xf32>
    %49 = arith.mulf %48, %38 : vector<8x16xf32>
    %50 = arith.addf %47, %49 : vector<8x16xf32>
    %51 = vector.broadcast %40 : f32 to vector<8x16xf32>
    %52 = arith.mulf %51, %37 : vector<8x16xf32>
    %53 = vector.broadcast %41 : f32 to vector<8x16xf32>
    %54 = arith.mulf %53, %38 : vector<8x16xf32>
    %55 = arith.addf %52, %54 : vector<8x16xf32>
    %56 = vector.broadcast %42 : f32 to vector<8x16xf32>
    %57 = arith.mulf %56, %39 : vector<8x16xf32>
    %58 = arith.addf %55, %57 : vector<8x16xf32>
    %c9 = arith.constant 9 : index
    %59 = memref.load %arg4[%c9] : memref<27xf32, #tpu.memory_space<smem>>
    %c12 = arith.constant 12 : index
    %60 = memref.load %arg4[%c12] : memref<27xf32, #tpu.memory_space<smem>>
    %c15 = arith.constant 15 : index
    %61 = memref.load %arg4[%c15] : memref<27xf32, #tpu.memory_space<smem>>
    %62 = vector.broadcast %59 : f32 to vector<8x16xf32>
    %63 = arith.mulf %62, %36 : vector<8x16xf32>
    %64 = vector.broadcast %60 : f32 to vector<8x16xf32>
    %65 = arith.mulf %64, %37 : vector<8x16xf32>
    %66 = arith.addf %63, %65 : vector<8x16xf32>
    %67 = vector.broadcast %61 : f32 to vector<8x16xf32>
    %68 = arith.mulf %67, %38 : vector<8x16xf32>
    %69 = arith.addf %66, %68 : vector<8x16xf32>
    %70 = vector.broadcast %59 : f32 to vector<8x16xf32>
    %71 = arith.mulf %70, %37 : vector<8x16xf32>
    %72 = vector.broadcast %60 : f32 to vector<8x16xf32>
    %73 = arith.mulf %72, %38 : vector<8x16xf32>
    %74 = arith.addf %71, %73 : vector<8x16xf32>
    %75 = vector.broadcast %61 : f32 to vector<8x16xf32>
    %76 = arith.mulf %75, %39 : vector<8x16xf32>
    %77 = arith.addf %74, %76 : vector<8x16xf32>
    %c18 = arith.constant 18 : index
    %78 = memref.load %arg4[%c18] : memref<27xf32, #tpu.memory_space<smem>>
    %c21 = arith.constant 21 : index
    %79 = memref.load %arg4[%c21] : memref<27xf32, #tpu.memory_space<smem>>
    %c24 = arith.constant 24 : index
    %80 = memref.load %arg4[%c24] : memref<27xf32, #tpu.memory_space<smem>>
    %81 = vector.broadcast %78 : f32 to vector<8x16xf32>
    %82 = arith.mulf %81, %36 : vector<8x16xf32>
    %83 = vector.broadcast %79 : f32 to vector<8x16xf32>
    %84 = arith.mulf %83, %37 : vector<8x16xf32>
    %85 = arith.addf %82, %84 : vector<8x16xf32>
    %86 = vector.broadcast %80 : f32 to vector<8x16xf32>
    %87 = arith.mulf %86, %38 : vector<8x16xf32>
    %88 = arith.addf %85, %87 : vector<8x16xf32>
    %89 = vector.broadcast %78 : f32 to vector<8x16xf32>
    %90 = arith.mulf %89, %37 : vector<8x16xf32>
    %91 = vector.broadcast %79 : f32 to vector<8x16xf32>
    %92 = arith.mulf %91, %38 : vector<8x16xf32>
    %93 = arith.addf %90, %92 : vector<8x16xf32>
    %94 = vector.broadcast %80 : f32 to vector<8x16xf32>
    %95 = arith.mulf %94, %39 : vector<8x16xf32>
    %96 = arith.addf %93, %95 : vector<8x16xf32>
    %c0_49 = arith.constant 0 : index
    %c1_50 = arith.constant 1 : index
    %97 = vector.load %arg7[%c0_49, %c1_50] : memref<9x18xf32, #tpu.memory_space<vmem>>, vector<8x16xf32>
    %c0_51 = arith.constant 0 : index
    %c1_52 = arith.constant 1 : index
    %98 = vector.load %arg8[%c0_51, %c1_52] : memref<9x18xf32, #tpu.memory_space<vmem>>, vector<8x16xf32>
    %c1_53 = arith.constant 1 : index
    %c1_54 = arith.constant 1 : index
    %99 = vector.load %arg7[%c1_53, %c1_54] : memref<9x18xf32, #tpu.memory_space<vmem>>, vector<8x16xf32>
    %c1_55 = arith.constant 1 : index
    %c1_56 = arith.constant 1 : index
    %100 = vector.load %arg8[%c1_55, %c1_56] : memref<9x18xf32, #tpu.memory_space<vmem>>, vector<8x16xf32>
    %c1_57 = arith.constant 1 : index
    %101 = memref.load %arg4[%c1_57] : memref<27xf32, #tpu.memory_space<smem>>
    %c4 = arith.constant 4 : index
    %102 = memref.load %arg4[%c4] : memref<27xf32, #tpu.memory_space<smem>>
    %c7 = arith.constant 7 : index
    %103 = memref.load %arg4[%c7] : memref<27xf32, #tpu.memory_space<smem>>
    %104 = vector.broadcast %101 : f32 to vector<8x16xf32>
    %105 = arith.mulf %104, %97 : vector<8x16xf32>
    %106 = vector.broadcast %102 : f32 to vector<8x16xf32>
    %107 = arith.mulf %106, %98 : vector<8x16xf32>
    %108 = arith.addf %105, %107 : vector<8x16xf32>
    %109 = vector.broadcast %103 : f32 to vector<8x16xf32>
    %110 = arith.mulf %109, %99 : vector<8x16xf32>
    %111 = arith.addf %108, %110 : vector<8x16xf32>
    %112 = vector.broadcast %101 : f32 to vector<8x16xf32>
    %113 = arith.mulf %112, %98 : vector<8x16xf32>
    %114 = vector.broadcast %102 : f32 to vector<8x16xf32>
    %115 = arith.mulf %114, %99 : vector<8x16xf32>
    %116 = arith.addf %113, %115 : vector<8x16xf32>
    %117 = vector.broadcast %103 : f32 to vector<8x16xf32>
    %118 = arith.mulf %117, %100 : vector<8x16xf32>
    %119 = arith.addf %116, %118 : vector<8x16xf32>
    %120 = arith.addf %50, %111 : vector<8x16xf32>
    %121 = arith.addf %58, %119 : vector<8x16xf32>
    %c10 = arith.constant 10 : index
    %122 = memref.load %arg4[%c10] : memref<27xf32, #tpu.memory_space<smem>>
    %c13 = arith.constant 13 : index
    %123 = memref.load %arg4[%c13] : memref<27xf32, #tpu.memory_space<smem>>
    %c16_58 = arith.constant 16 : index
    %124 = memref.load %arg4[%c16_58] : memref<27xf32, #tpu.memory_space<smem>>
    %125 = vector.broadcast %122 : f32 to vector<8x16xf32>
    %126 = arith.mulf %125, %97 : vector<8x16xf32>
    %127 = vector.broadcast %123 : f32 to vector<8x16xf32>
    %128 = arith.mulf %127, %98 : vector<8x16xf32>
    %129 = arith.addf %126, %128 : vector<8x16xf32>
    %130 = vector.broadcast %124 : f32 to vector<8x16xf32>
    %131 = arith.mulf %130, %99 : vector<8x16xf32>
    %132 = arith.addf %129, %131 : vector<8x16xf32>
    %133 = vector.broadcast %122 : f32 to vector<8x16xf32>
    %134 = arith.mulf %133, %98 : vector<8x16xf32>
    %135 = vector.broadcast %123 : f32 to vector<8x16xf32>
    %136 = arith.mulf %135, %99 : vector<8x16xf32>
    %137 = arith.addf %134, %136 : vector<8x16xf32>
    %138 = vector.broadcast %124 : f32 to vector<8x16xf32>
    %139 = arith.mulf %138, %100 : vector<8x16xf32>
    %140 = arith.addf %137, %139 : vector<8x16xf32>
    %141 = arith.addf %69, %132 : vector<8x16xf32>
    %142 = arith.addf %77, %140 : vector<8x16xf32>
    %c19 = arith.constant 19 : index
    %143 = memref.load %arg4[%c19] : memref<27xf32, #tpu.memory_space<smem>>
    %c22 = arith.constant 22 : index
    %144 = memref.load %arg4[%c22] : memref<27xf32, #tpu.memory_space<smem>>
    %c25 = arith.constant 25 : index
    %145 = memref.load %arg4[%c25] : memref<27xf32, #tpu.memory_space<smem>>
    %146 = vector.broadcast %143 : f32 to vector<8x16xf32>
    %147 = arith.mulf %146, %97 : vector<8x16xf32>
    %148 = vector.broadcast %144 : f32 to vector<8x16xf32>
    %149 = arith.mulf %148, %98 : vector<8x16xf32>
    %150 = arith.addf %147, %149 : vector<8x16xf32>
    %151 = vector.broadcast %145 : f32 to vector<8x16xf32>
    %152 = arith.mulf %151, %99 : vector<8x16xf32>
    %153 = arith.addf %150, %152 : vector<8x16xf32>
    %154 = vector.broadcast %143 : f32 to vector<8x16xf32>
    %155 = arith.mulf %154, %98 : vector<8x16xf32>
    %156 = vector.broadcast %144 : f32 to vector<8x16xf32>
    %157 = arith.mulf %156, %99 : vector<8x16xf32>
    %158 = arith.addf %155, %157 : vector<8x16xf32>
    %159 = vector.broadcast %145 : f32 to vector<8x16xf32>
    %160 = arith.mulf %159, %100 : vector<8x16xf32>
    %161 = arith.addf %158, %160 : vector<8x16xf32>
    %162 = arith.addf %88, %153 : vector<8x16xf32>
    %163 = arith.addf %96, %161 : vector<8x16xf32>
    %c0_59 = arith.constant 0 : index
    %c2 = arith.constant 2 : index
    %164 = vector.load %arg7[%c0_59, %c2] : memref<9x18xf32, #tpu.memory_space<vmem>>, vector<8x16xf32>
    %c0_60 = arith.constant 0 : index
    %c2_61 = arith.constant 2 : index
    %165 = vector.load %arg8[%c0_60, %c2_61] : memref<9x18xf32, #tpu.memory_space<vmem>>, vector<8x16xf32>
    %c1_62 = arith.constant 1 : index
    %c2_63 = arith.constant 2 : index
    %166 = vector.load %arg7[%c1_62, %c2_63] : memref<9x18xf32, #tpu.memory_space<vmem>>, vector<8x16xf32>
    %c1_64 = arith.constant 1 : index
    %c2_65 = arith.constant 2 : index
    %167 = vector.load %arg8[%c1_64, %c2_65] : memref<9x18xf32, #tpu.memory_space<vmem>>, vector<8x16xf32>
    %c2_66 = arith.constant 2 : index
    %168 = memref.load %arg4[%c2_66] : memref<27xf32, #tpu.memory_space<smem>>
    %c5 = arith.constant 5 : index
    %169 = memref.load %arg4[%c5] : memref<27xf32, #tpu.memory_space<smem>>
    %c8_67 = arith.constant 8 : index
    %170 = memref.load %arg4[%c8_67] : memref<27xf32, #tpu.memory_space<smem>>
    %171 = vector.broadcast %168 : f32 to vector<8x16xf32>
    %172 = arith.mulf %171, %164 : vector<8x16xf32>
    %173 = vector.broadcast %169 : f32 to vector<8x16xf32>
    %174 = arith.mulf %173, %165 : vector<8x16xf32>
    %175 = arith.addf %172, %174 : vector<8x16xf32>
    %176 = vector.broadcast %170 : f32 to vector<8x16xf32>
    %177 = arith.mulf %176, %166 : vector<8x16xf32>
    %178 = arith.addf %175, %177 : vector<8x16xf32>
    %179 = vector.broadcast %168 : f32 to vector<8x16xf32>
    %180 = arith.mulf %179, %165 : vector<8x16xf32>
    %181 = vector.broadcast %169 : f32 to vector<8x16xf32>
    %182 = arith.mulf %181, %166 : vector<8x16xf32>
    %183 = arith.addf %180, %182 : vector<8x16xf32>
    %184 = vector.broadcast %170 : f32 to vector<8x16xf32>
    %185 = arith.mulf %184, %167 : vector<8x16xf32>
    %186 = arith.addf %183, %185 : vector<8x16xf32>
    %187 = arith.addf %120, %178 : vector<8x16xf32>
    %188 = arith.addf %121, %186 : vector<8x16xf32>
    %c11 = arith.constant 11 : index
    %189 = memref.load %arg4[%c11] : memref<27xf32, #tpu.memory_space<smem>>
    %c14 = arith.constant 14 : index
    %190 = memref.load %arg4[%c14] : memref<27xf32, #tpu.memory_space<smem>>
    %c17_68 = arith.constant 17 : index
    %191 = memref.load %arg4[%c17_68] : memref<27xf32, #tpu.memory_space<smem>>
    %192 = vector.broadcast %189 : f32 to vector<8x16xf32>
    %193 = arith.mulf %192, %164 : vector<8x16xf32>
    %194 = vector.broadcast %190 : f32 to vector<8x16xf32>
    %195 = arith.mulf %194, %165 : vector<8x16xf32>
    %196 = arith.addf %193, %195 : vector<8x16xf32>
    %197 = vector.broadcast %191 : f32 to vector<8x16xf32>
    %198 = arith.mulf %197, %166 : vector<8x16xf32>
    %199 = arith.addf %196, %198 : vector<8x16xf32>
    %200 = vector.broadcast %189 : f32 to vector<8x16xf32>
    %201 = arith.mulf %200, %165 : vector<8x16xf32>
    %202 = vector.broadcast %190 : f32 to vector<8x16xf32>
    %203 = arith.mulf %202, %166 : vector<8x16xf32>
    %204 = arith.addf %201, %203 : vector<8x16xf32>
    %205 = vector.broadcast %191 : f32 to vector<8x16xf32>
    %206 = arith.mulf %205, %167 : vector<8x16xf32>
    %207 = arith.addf %204, %206 : vector<8x16xf32>
    %208 = arith.addf %141, %199 : vector<8x16xf32>
    %209 = arith.addf %142, %207 : vector<8x16xf32>
    %c20 = arith.constant 20 : index
    %210 = memref.load %arg4[%c20] : memref<27xf32, #tpu.memory_space<smem>>
    %c23 = arith.constant 23 : index
    %211 = memref.load %arg4[%c23] : memref<27xf32, #tpu.memory_space<smem>>
    %c26 = arith.constant 26 : index
    %212 = memref.load %arg4[%c26] : memref<27xf32, #tpu.memory_space<smem>>
    %213 = vector.broadcast %210 : f32 to vector<8x16xf32>
    %214 = arith.mulf %213, %164 : vector<8x16xf32>
    %215 = vector.broadcast %211 : f32 to vector<8x16xf32>
    %216 = arith.mulf %215, %165 : vector<8x16xf32>
    %217 = arith.addf %214, %216 : vector<8x16xf32>
    %218 = vector.broadcast %212 : f32 to vector<8x16xf32>
    %219 = arith.mulf %218, %166 : vector<8x16xf32>
    %220 = arith.addf %217, %219 : vector<8x16xf32>
    %221 = vector.broadcast %210 : f32 to vector<8x16xf32>
    %222 = arith.mulf %221, %165 : vector<8x16xf32>
    %223 = vector.broadcast %211 : f32 to vector<8x16xf32>
    %224 = arith.mulf %223, %166 : vector<8x16xf32>
    %225 = arith.addf %222, %224 : vector<8x16xf32>
    %226 = vector.broadcast %212 : f32 to vector<8x16xf32>
    %227 = arith.mulf %226, %167 : vector<8x16xf32>
    %228 = arith.addf %225, %227 : vector<8x16xf32>
    %229 = arith.addf %162, %220 : vector<8x16xf32>
    %230 = arith.addf %163, %228 : vector<8x16xf32>
    %c0_69 = arith.constant 0 : index
    %231 = memref.load %arg5[%c0_69] : memref<3xf32, #tpu.memory_space<smem>>
    %232 = vector.broadcast %231 : f32 to vector<8x16xf32>
    %233 = arith.addf %187, %232 : vector<8x16xf32>
    %c0_70 = arith.constant 0 : index
    %c32 = arith.constant 32 : index
    %c0_71 = arith.constant 0 : index
    %234 = vector.load %arg6[%c0_70, %c32, %c0_71] : memref<2x56x32xf32, #tpu.memory_space<vmem>>, vector<1x8x16xf32>
    %235 = vector.shape_cast %234 : vector<1x8x16xf32> to vector<8x16xf32>
    %236 = vector.shape_cast %233 : vector<8x16xf32> to vector<1x8x16xf32>
    tpu.vector_store %arg6[%c0_70, %c32, %c0_71], %236 {strides = array<i32>} : memref<2x56x32xf32, #tpu.memory_space<vmem>>, vector<1x8x16xf32>,
    %c0_72 = arith.constant 0 : index
    %237 = memref.load %arg5[%c0_72] : memref<3xf32, #tpu.memory_space<smem>>
    %238 = vector.broadcast %237 : f32 to vector<8x16xf32>
    %239 = arith.addf %188, %238 : vector<8x16xf32>
    %c0_73 = arith.constant 0 : index
    %c32_74 = arith.constant 32 : index
    %c16_75 = arith.constant 16 : index
    %240 = vector.load %arg6[%c0_73, %c32_74, %c16_75] : memref<2x56x32xf32, #tpu.memory_space<vmem>>, vector<1x8x16xf32>
    %241 = vector.shape_cast %240 : vector<1x8x16xf32> to vector<8x16xf32>
    %242 = vector.shape_cast %239 : vector<8x16xf32> to vector<1x8x16xf32>
    tpu.vector_store %arg6[%c0_73, %c32_74, %c16_75], %242 {strides = array<i32>} : memref<2x56x32xf32, #tpu.memory_space<vmem>>, vector<1x8x16xf32>,
    %c1_76 = arith.constant 1 : index
    %243 = memref.load %arg5[%c1_76] : memref<3xf32, #tpu.memory_space<smem>>
    %244 = vector.broadcast %243 : f32 to vector<8x16xf32>
    %245 = arith.addf %208, %244 : vector<8x16xf32>
    %c0_77 = arith.constant 0 : index
    %c40 = arith.constant 40 : index
    %c0_78 = arith.constant 0 : index
    %246 = vector.load %arg6[%c0_77, %c40, %c0_78] : memref<2x56x32xf32, #tpu.memory_space<vmem>>, vector<1x8x16xf32>
    %247 = vector.shape_cast %246 : vector<1x8x16xf32> to vector<8x16xf32>
    %248 = vector.shape_cast %245 : vector<8x16xf32> to vector<1x8x16xf32>
    tpu.vector_store %arg6[%c0_77, %c40, %c0_78], %248 {strides = array<i32>} : memref<2x56x32xf32, #tpu.memory_space<vmem>>, vector<1x8x16xf32>,
    %c1_79 = arith.constant 1 : index
    %249 = memref.load %arg5[%c1_79] : memref<3xf32, #tpu.memory_space<smem>>
    %250 = vector.broadcast %249 : f32 to vector<8x16xf32>
    %251 = arith.addf %209, %250 : vector<8x16xf32>
    %c0_80 = arith.constant 0 : index
    %c40_81 = arith.constant 40 : index
    %c16_82 = arith.constant 16 : index
    %252 = vector.load %arg6[%c0_80, %c40_81, %c16_82] : memref<2x56x32xf32, #tpu.memory_space<vmem>>, vector<1x8x16xf32>
    %253 = vector.shape_cast %252 : vector<1x8x16xf32> to vector<8x16xf32>
    %254 = vector.shape_cast %251 : vector<8x16xf32> to vector<1x8x16xf32>
    tpu.vector_store %arg6[%c0_80, %c40_81, %c16_82], %254 {strides = array<i32>} : memref<2x56x32xf32, #tpu.memory_space<vmem>>, vector<1x8x16xf32>,
    %c2_83 = arith.constant 2 : index
    %255 = memref.load %arg5[%c2_83] : memref<3xf32, #tpu.memory_space<smem>>
    %256 = vector.broadcast %255 : f32 to vector<8x16xf32>
    %257 = arith.addf %229, %256 : vector<8x16xf32>
    %c0_84 = arith.constant 0 : index
    %c48 = arith.constant 48 : index
    %c0_85 = arith.constant 0 : index
    %258 = vector.load %arg6[%c0_84, %c48, %c0_85] : memref<2x56x32xf32, #tpu.memory_space<vmem>>, vector<1x8x16xf32>
    %259 = vector.shape_cast %258 : vector<1x8x16xf32> to vector<8x16xf32>
    %260 = vector.shape_cast %257 : vector<8x16xf32> to vector<1x8x16xf32>
    tpu.vector_store %arg6[%c0_84, %c48, %c0_85], %260 {strides = array<i32>} : memref<2x56x32xf32, #tpu.memory_space<vmem>>, vector<1x8x16xf32>,
    %c2_86 = arith.constant 2 : index
    %261 = memref.load %arg5[%c2_86] : memref<3xf32, #tpu.memory_space<smem>>
    %262 = vector.broadcast %261 : f32 to vector<8x16xf32>
    %263 = arith.addf %230, %262 : vector<8x16xf32>
    %c0_87 = arith.constant 0 : index
    %c48_88 = arith.constant 48 : index
    %c16_89 = arith.constant 16 : index
    %264 = vector.load %arg6[%c0_87, %c48_88, %c16_89] : memref<2x56x32xf32, #tpu.memory_space<vmem>>, vector<1x8x16xf32>
    %265 = vector.shape_cast %264 : vector<1x8x16xf32> to vector<8x16xf32>
    %266 = vector.shape_cast %263 : vector<8x16xf32> to vector<1x8x16xf32>
    tpu.vector_store %arg6[%c0_87, %c48_88, %c16_89], %266 {strides = array<i32>} : memref<2x56x32xf32, #tpu.memory_space<vmem>>, vector<1x8x16xf32>,
    %c1_90 = arith.constant 1 : index
    %c0_91 = arith.constant 0 : index
    %c16_92 = arith.constant 16 : index
    %267 = vector.load %arg2[%c1_90, %c0_91, %c16_92] : memref<2x8x32xf32, #tpu.memory_space<vmem>>, vector<1x8x16xf32>
    %268 = vector.shape_cast %267 : vector<1x8x16xf32> to vector<8x16xf32>
    %c1_93 = arith.constant 1 : index
    %c1_94 = arith.constant 1 : index
    %269 = vector.load %arg7[%c1_93, %c1_94] : memref<9x18xf32, #tpu.memory_space<vmem>>, vector<8x16xf32>
    tpu.vector_store %arg7[%c1_93, %c1_94], %268 {strides = array<i32>} : memref<9x18xf32, #tpu.memory_space<vmem>>, vector<8x16xf32>,
    %c1_95 = arith.constant 1 : index
    %c0_96 = arith.constant 0 : index
    %c0_97 = arith.constant 0 : index
    %270 = vector.load %arg2[%c1_95, %c0_96, %c0_97] : memref<2x8x32xf32, #tpu.memory_space<vmem>>, vector<1x8x16xf32>
    %271 = vector.shape_cast %270 : vector<1x8x16xf32> to vector<8x16xf32>
    %c0_98 = arith.constant 0 : index
    %c1_99 = arith.constant 1 : index
    %272 = vector.load %arg8[%c0_98, %c1_99] : memref<9x18xf32, #tpu.memory_space<vmem>>, vector<8x16xf32>
    tpu.vector_store %arg8[%c0_98, %c1_99], %271 {strides = array<i32>} : memref<9x18xf32, #tpu.memory_space<vmem>>, vector<8x16xf32>,
    %c0_100 = arith.constant 0 : index
    %c0_101 = arith.constant 0 : index
    %273 = vector.load %arg7[%c0_100, %c0_101] : memref<9x18xf32, #tpu.memory_space<vmem>>, vector<8x16xf32>
    %c0_102 = arith.constant 0 : index
    %c0_103 = arith.constant 0 : index
    %274 = vector.load %arg8[%c0_102, %c0_103] : memref<9x18xf32, #tpu.memory_space<vmem>>, vector<8x16xf32>
    %c1_104 = arith.constant 1 : index
    %c0_105 = arith.constant 0 : index
    %275 = vector.load %arg7[%c1_104, %c0_105] : memref<9x18xf32, #tpu.memory_space<vmem>>, vector<8x16xf32>
    %c1_106 = arith.constant 1 : index
    %c0_107 = arith.constant 0 : index
    %276 = vector.load %arg8[%c1_106, %c0_107] : memref<9x18xf32, #tpu.memory_space<vmem>>, vector<8x16xf32>
    %c0_108 = arith.constant 0 : index
    %277 = memref.load %arg4[%c0_108] : memref<27xf32, #tpu.memory_space<smem>>
    %c3_109 = arith.constant 3 : index
    %278 = memref.load %arg4[%c3_109] : memref<27xf32, #tpu.memory_space<smem>>
    %c6_110 = arith.constant 6 : index
    %279 = memref.load %arg4[%c6_110] : memref<27xf32, #tpu.memory_space<smem>>
    %280 = vector.broadcast %277 : f32 to vector<8x16xf32>
    %281 = arith.mulf %280, %273 : vector<8x16xf32>
    %282 = vector.broadcast %278 : f32 to vector<8x16xf32>
    %283 = arith.mulf %282, %274 : vector<8x16xf32>
    %284 = arith.addf %281, %283 : vector<8x16xf32>
    %285 = vector.broadcast %279 : f32 to vector<8x16xf32>
    %286 = arith.mulf %285, %275 : vector<8x16xf32>
    %287 = arith.addf %284, %286 : vector<8x16xf32>
    %288 = vector.broadcast %277 : f32 to vector<8x16xf32>
    %289 = arith.mulf %288, %274 : vector<8x16xf32>
    %290 = vector.broadcast %278 : f32 to vector<8x16xf32>
    %291 = arith.mulf %290, %275 : vector<8x16xf32>
    %292 = arith.addf %289, %291 : vector<8x16xf32>
    %293 = vector.broadcast %279 : f32 to vector<8x16xf32>
    %294 = arith.mulf %293, %276 : vector<8x16xf32>
    %295 = arith.addf %292, %294 : vector<8x16xf32>
    %c9_111 = arith.constant 9 : index
    %296 = memref.load %arg4[%c9_111] : memref<27xf32, #tpu.memory_space<smem>>
    %c12_112 = arith.constant 12 : index
    %297 = memref.load %arg4[%c12_112] : memref<27xf32, #tpu.memory_space<smem>>
    %c15_113 = arith.constant 15 : index
    %298 = memref.load %arg4[%c15_113] : memref<27xf32, #tpu.memory_space<smem>>
    %299 = vector.broadcast %296 : f32 to vector<8x16xf32>
    %300 = arith.mulf %299, %273 : vector<8x16xf32>
    %301 = vector.broadcast %297 : f32 to vector<8x16xf32>
    %302 = arith.mulf %301, %274 : vector<8x16xf32>
    %303 = arith.addf %300, %302 : vector<8x16xf32>
    %304 = vector.broadcast %298 : f32 to vector<8x16xf32>
    %305 = arith.mulf %304, %275 : vector<8x16xf32>
    %306 = arith.addf %303, %305 : vector<8x16xf32>
    %307 = vector.broadcast %296 : f32 to vector<8x16xf32>
    %308 = arith.mulf %307, %274 : vector<8x16xf32>
    %309 = vector.broadcast %297 : f32 to vector<8x16xf32>
    %310 = arith.mulf %309, %275 : vector<8x16xf32>
    %311 = arith.addf %308, %310 : vector<8x16xf32>
    %312 = vector.broadcast %298 : f32 to vector<8x16xf32>
    %313 = arith.mulf %312, %276 : vector<8x16xf32>
    %314 = arith.addf %311, %313 : vector<8x16xf32>
    %c18_114 = arith.constant 18 : index
    %315 = memref.load %arg4[%c18_114] : memref<27xf32, #tpu.memory_space<smem>>
    %c21_115 = arith.constant 21 : index
    %316 = memref.load %arg4[%c21_115] : memref<27xf32, #tpu.memory_space<smem>>
    %c24_116 = arith.constant 24 : index
    %317 = memref.load %arg4[%c24_116] : memref<27xf32, #tpu.memory_space<smem>>
    %318 = vector.broadcast %315 : f32 to vector<8x16xf32>
    %319 = arith.mulf %318, %273 : vector<8x16xf32>
    %320 = vector.broadcast %316 : f32 to vector<8x16xf32>
    %321 = arith.mulf %320, %274 : vector<8x16xf32>
    %322 = arith.addf %319, %321 : vector<8x16xf32>
    %323 = vector.broadcast %317 : f32 to vector<8x16xf32>
    %324 = arith.mulf %323, %275 : vector<8x16xf32>
    %325 = arith.addf %322, %324 : vector<8x16xf32>
    %326 = vector.broadcast %315 : f32 to vector<8x16xf32>
    %327 = arith.mulf %326, %274 : vector<8x16xf32>
    %328 = vector.broadcast %316 : f32 to vector<8x16xf32>
    %329 = arith.mulf %328, %275 : vector<8x16xf32>
    %330 = arith.addf %327, %329 : vector<8x16xf32>
    %331 = vector.broadcast %317 : f32 to vector<8x16xf32>
    %332 = arith.mulf %331, %276 : vector<8x16xf32>
    %333 = arith.addf %330, %332 : vector<8x16xf32>
    %c0_117 = arith.constant 0 : index
    %c1_118 = arith.constant 1 : index
    %334 = vector.load %arg7[%c0_117, %c1_118] : memref<9x18xf32, #tpu.memory_space<vmem>>, vector<8x16xf32>
    %c0_119 = arith.constant 0 : index
    %c1_120 = arith.constant 1 : index
    %335 = vector.load %arg8[%c0_119, %c1_120] : memref<9x18xf32, #tpu.memory_space<vmem>>, vector<8x16xf32>
    %c1_121 = arith.constant 1 : index
    %c1_122 = arith.constant 1 : index
    %336 = vector.load %arg7[%c1_121, %c1_122] : memref<9x18xf32, #tpu.memory_space<vmem>>, vector<8x16xf32>
    %c1_123 = arith.constant 1 : index
    %c1_124 = arith.constant 1 : index
    %337 = vector.load %arg8[%c1_123, %c1_124] : memref<9x18xf32, #tpu.memory_space<vmem>>, vector<8x16xf32>
    %c1_125 = arith.constant 1 : index
    %338 = memref.load %arg4[%c1_125] : memref<27xf32, #tpu.memory_space<smem>>
    %c4_126 = arith.constant 4 : index
    %339 = memref.load %arg4[%c4_126] : memref<27xf32, #tpu.memory_space<smem>>
    %c7_127 = arith.constant 7 : index
    %340 = memref.load %arg4[%c7_127] : memref<27xf32, #tpu.memory_space<smem>>
    %341 = vector.broadcast %338 : f32 to vector<8x16xf32>
    %342 = arith.mulf %341, %334 : vector<8x16xf32>
    %343 = vector.broadcast %339 : f32 to vector<8x16xf32>
    %344 = arith.mulf %343, %335 : vector<8x16xf32>
    %345 = arith.addf %342, %344 : vector<8x16xf32>
    %346 = vector.broadcast %340 : f32 to vector<8x16xf32>
    %347 = arith.mulf %346, %336 : vector<8x16xf32>
    %348 = arith.addf %345, %347 : vector<8x16xf32>
    %349 = vector.broadcast %338 : f32 to vector<8x16xf32>
    %350 = arith.mulf %349, %335 : vector<8x16xf32>
    %351 = vector.broadcast %339 : f32 to vector<8x16xf32>
    %352 = arith.mulf %351, %336 : vector<8x16xf32>
    %353 = arith.addf %350, %352 : vector<8x16xf32>
    %354 = vector.broadcast %340 : f32 to vector<8x16xf32>
    %355 = arith.mulf %354, %337 : vector<8x16xf32>
    %356 = arith.addf %353, %355 : vector<8x16xf32>
    %357 = arith.addf %287, %348 : vector<8x16xf32>
    %358 = arith.addf %295, %356 : vector<8x16xf32>
    %c10_128 = arith.constant 10 : index
    %359 = memref.load %arg4[%c10_128] : memref<27xf32, #tpu.memory_space<smem>>
    %c13_129 = arith.constant 13 : index
    %360 = memref.load %arg4[%c13_129] : memref<27xf32, #tpu.memory_space<smem>>
    %c16_130 = arith.constant 16 : index
    %361 = memref.load %arg4[%c16_130] : memref<27xf32, #tpu.memory_space<smem>>
    %362 = vector.broadcast %359 : f32 to vector<8x16xf32>
    %363 = arith.mulf %362, %334 : vector<8x16xf32>
    %364 = vector.broadcast %360 : f32 to vector<8x16xf32>
    %365 = arith.mulf %364, %335 : vector<8x16xf32>
    %366 = arith.addf %363, %365 : vector<8x16xf32>
    %367 = vector.broadcast %361 : f32 to vector<8x16xf32>
    %368 = arith.mulf %367, %336 : vector<8x16xf32>
    %369 = arith.addf %366, %368 : vector<8x16xf32>
    %370 = vector.broadcast %359 : f32 to vector<8x16xf32>
    %371 = arith.mulf %370, %335 : vector<8x16xf32>
    %372 = vector.broadcast %360 : f32 to vector<8x16xf32>
    %373 = arith.mulf %372, %336 : vector<8x16xf32>
    %374 = arith.addf %371, %373 : vector<8x16xf32>
    %375 = vector.broadcast %361 : f32 to vector<8x16xf32>
    %376 = arith.mulf %375, %337 : vector<8x16xf32>
    %377 = arith.addf %374, %376 : vector<8x16xf32>
    %378 = arith.addf %306, %369 : vector<8x16xf32>
    %379 = arith.addf %314, %377 : vector<8x16xf32>
    %c19_131 = arith.constant 19 : index
    %380 = memref.load %arg4[%c19_131] : memref<27xf32, #tpu.memory_space<smem>>
    %c22_132 = arith.constant 22 : index
    %381 = memref.load %arg4[%c22_132] : memref<27xf32, #tpu.memory_space<smem>>
    %c25_133 = arith.constant 25 : index
    %382 = memref.load %arg4[%c25_133] : memref<27xf32, #tpu.memory_space<smem>>
    %383 = vector.broadcast %380 : f32 to vector<8x16xf32>
    %384 = arith.mulf %383, %334 : vector<8x16xf32>
    %385 = vector.broadcast %381 : f32 to vector<8x16xf32>
    %386 = arith.mulf %385, %335 : vector<8x16xf32>
    %387 = arith.addf %384, %386 : vector<8x16xf32>
    %388 = vector.broadcast %382 : f32 to vector<8x16xf32>
    %389 = arith.mulf %388, %336 : vector<8x16xf32>
    %390 = arith.addf %387, %389 : vector<8x16xf32>
    %391 = vector.broadcast %380 : f32 to vector<8x16xf32>
    %392 = arith.mulf %391, %335 : vector<8x16xf32>
    %393 = vector.broadcast %381 : f32 to vector<8x16xf32>
    %394 = arith.mulf %393, %336 : vector<8x16xf32>
    %395 = arith.addf %392, %394 : vector<8x16xf32>
    %396 = vector.broadcast %382 : f32 to vector<8x16xf32>
    %397 = arith.mulf %396, %337 : vector<8x16xf32>
    %398 = arith.addf %395, %397 : vector<8x16xf32>
    %399 = arith.addf %325, %390 : vector<8x16xf32>
    %400 = arith.addf %333, %398 : vector<8x16xf32>
    %c0_134 = arith.constant 0 : index
    %c2_135 = arith.constant 2 : index
    %401 = vector.load %arg7[%c0_134, %c2_135] : memref<9x18xf32, #tpu.memory_space<vmem>>, vector<8x16xf32>
    %c0_136 = arith.constant 0 : index
    %c2_137 = arith.constant 2 : index
    %402 = vector.load %arg8[%c0_136, %c2_137] : memref<9x18xf32, #tpu.memory_space<vmem>>, vector<8x16xf32>
    %c1_138 = arith.constant 1 : index
    %c2_139 = arith.constant 2 : index
    %403 = vector.load %arg7[%c1_138, %c2_139] : memref<9x18xf32, #tpu.memory_space<vmem>>, vector<8x16xf32>
    %c1_140 = arith.constant 1 : index
    %c2_141 = arith.constant 2 : index
    %404 = vector.load %arg8[%c1_140, %c2_141] : memref<9x18xf32, #tpu.memory_space<vmem>>, vector<8x16xf32>
    %c2_142 = arith.constant 2 : index
    %405 = memref.load %arg4[%c2_142] : memref<27xf32, #tpu.memory_space<smem>>
    %c5_143 = arith.constant 5 : index
    %406 = memref.load %arg4[%c5_143] : memref<27xf32, #tpu.memory_space<smem>>
    %c8_144 = arith.constant 8 : index
    %407 = memref.load %arg4[%c8_144] : memref<27xf32, #tpu.memory_space<smem>>
    %408 = vector.broadcast %405 : f32 to vector<8x16xf32>
    %409 = arith.mulf %408, %401 : vector<8x16xf32>
    %410 = vector.broadcast %406 : f32 to vector<8x16xf32>
    %411 = arith.mulf %410, %402 : vector<8x16xf32>
    %412 = arith.addf %409, %411 : vector<8x16xf32>
    %413 = vector.broadcast %407 : f32 to vector<8x16xf32>
    %414 = arith.mulf %413, %403 : vector<8x16xf32>
    %415 = arith.addf %412, %414 : vector<8x16xf32>
    %416 = vector.broadcast %405 : f32 to vector<8x16xf32>
    %417 = arith.mulf %416, %402 : vector<8x16xf32>
    %418 = vector.broadcast %406 : f32 to vector<8x16xf32>
    %419 = arith.mulf %418, %403 : vector<8x16xf32>
    %420 = arith.addf %417, %419 : vector<8x16xf32>
    %421 = vector.broadcast %407 : f32 to vector<8x16xf32>
    %422 = arith.mulf %421, %404 : vector<8x16xf32>
    %423 = arith.addf %420, %422 : vector<8x16xf32>
    %424 = arith.addf %357, %415 : vector<8x16xf32>
    %425 = arith.addf %358, %423 : vector<8x16xf32>
    %c11_145 = arith.constant 11 : index
    %426 = memref.load %arg4[%c11_145] : memref<27xf32, #tpu.memory_space<smem>>
    %c14_146 = arith.constant 14 : index
    %427 = memref.load %arg4[%c14_146] : memref<27xf32, #tpu.memory_space<smem>>
    %c17_147 = arith.constant 17 : index
    %428 = memref.load %arg4[%c17_147] : memref<27xf32, #tpu.memory_space<smem>>
    %429 = vector.broadcast %426 : f32 to vector<8x16xf32>
    %430 = arith.mulf %429, %401 : vector<8x16xf32>
    %431 = vector.broadcast %427 : f32 to vector<8x16xf32>
    %432 = arith.mulf %431, %402 : vector<8x16xf32>
    %433 = arith.addf %430, %432 : vector<8x16xf32>
    %434 = vector.broadcast %428 : f32 to vector<8x16xf32>
    %435 = arith.mulf %434, %403 : vector<8x16xf32>
    %436 = arith.addf %433, %435 : vector<8x16xf32>
    %437 = vector.broadcast %426 : f32 to vector<8x16xf32>
    %438 = arith.mulf %437, %402 : vector<8x16xf32>
    %439 = vector.broadcast %427 : f32 to vector<8x16xf32>
    %440 = arith.mulf %439, %403 : vector<8x16xf32>
    %441 = arith.addf %438, %440 : vector<8x16xf32>
    %442 = vector.broadcast %428 : f32 to vector<8x16xf32>
    %443 = arith.mulf %442, %404 : vector<8x16xf32>
    %444 = arith.addf %441, %443 : vector<8x16xf32>
    %445 = arith.addf %378, %436 : vector<8x16xf32>
    %446 = arith.addf %379, %444 : vector<8x16xf32>
    %c20_148 = arith.constant 20 : index
    %447 = memref.load %arg4[%c20_148] : memref<27xf32, #tpu.memory_space<smem>>
    %c23_149 = arith.constant 23 : index
    %448 = memref.load %arg4[%c23_149] : memref<27xf32, #tpu.memory_space<smem>>
    %c26_150 = arith.constant 26 : index
    %449 = memref.load %arg4[%c26_150] : memref<27xf32, #tpu.memory_space<smem>>
    %450 = vector.broadcast %447 : f32 to vector<8x16xf32>
    %451 = arith.mulf %450, %401 : vector<8x16xf32>
    %452 = vector.broadcast %448 : f32 to vector<8x16xf32>
    %453 = arith.mulf %452, %402 : vector<8x16xf32>
    %454 = arith.addf %451, %453 : vector<8x16xf32>
    %455 = vector.broadcast %449 : f32 to vector<8x16xf32>
    %456 = arith.mulf %455, %403 : vector<8x16xf32>
    %457 = arith.addf %454, %456 : vector<8x16xf32>
    %458 = vector.broadcast %447 : f32 to vector<8x16xf32>
    %459 = arith.mulf %458, %402 : vector<8x16xf32>
    %460 = vector.broadcast %448 : f32 to vector<8x16xf32>
    %461 = arith.mulf %460, %403 : vector<8x16xf32>
    %462 = arith.addf %459, %461 : vector<8x16xf32>
    %463 = vector.broadcast %449 : f32 to vector<8x16xf32>
    %464 = arith.mulf %463, %404 : vector<8x16xf32>
    %465 = arith.addf %462, %464 : vector<8x16xf32>
    %466 = arith.addf %399, %457 : vector<8x16xf32>
    %467 = arith.addf %400, %465 : vector<8x16xf32>
    %c0_151 = arith.constant 0 : index
    %468 = memref.load %arg5[%c0_151] : memref<3xf32, #tpu.memory_space<smem>>
    %469 = vector.broadcast %468 : f32 to vector<8x16xf32>
    %470 = arith.addf %424, %469 : vector<8x16xf32>
    %c1_152 = arith.constant 1 : index
    %c32_153 = arith.constant 32 : index
    %c0_154 = arith.constant 0 : index
    %471 = vector.load %arg6[%c1_152, %c32_153, %c0_154] : memref<2x56x32xf32, #tpu.memory_space<vmem>>, vector<1x8x16xf32>
    %472 = vector.shape_cast %471 : vector<1x8x16xf32> to vector<8x16xf32>
    %473 = vector.shape_cast %470 : vector<8x16xf32> to vector<1x8x16xf32>
    tpu.vector_store %arg6[%c1_152, %c32_153, %c0_154], %473 {strides = array<i32>} : memref<2x56x32xf32, #tpu.memory_space<vmem>>, vector<1x8x16xf32>,
    %c0_155 = arith.constant 0 : index
    %474 = memref.load %arg5[%c0_155] : memref<3xf32, #tpu.memory_space<smem>>
    %475 = vector.broadcast %474 : f32 to vector<8x16xf32>
    %476 = arith.addf %425, %475 : vector<8x16xf32>
    %c1_156 = arith.constant 1 : index
    %c32_157 = arith.constant 32 : index
    %c16_158 = arith.constant 16 : index
    %477 = vector.load %arg6[%c1_156, %c32_157, %c16_158] : memref<2x56x32xf32, #tpu.memory_space<vmem>>, vector<1x8x16xf32>
    %478 = vector.shape_cast %477 : vector<1x8x16xf32> to vector<8x16xf32>
    %479 = vector.shape_cast %476 : vector<8x16xf32> to vector<1x8x16xf32>
    tpu.vector_store %arg6[%c1_156, %c32_157, %c16_158], %479 {strides = array<i32>} : memref<2x56x32xf32, #tpu.memory_space<vmem>>, vector<1x8x16xf32>,
    %c1_159 = arith.constant 1 : index
    %480 = memref.load %arg5[%c1_159] : memref<3xf32, #tpu.memory_space<smem>>
    %481 = vector.broadcast %480 : f32 to vector<8x16xf32>
    %482 = arith.addf %445, %481 : vector<8x16xf32>
    %c1_160 = arith.constant 1 : index
    %c40_161 = arith.constant 40 : index
    %c0_162 = arith.constant 0 : index
    %483 = vector.load %arg6[%c1_160, %c40_161, %c0_162] : memref<2x56x32xf32, #tpu.memory_space<vmem>>, vector<1x8x16xf32>
    %484 = vector.shape_cast %483 : vector<1x8x16xf32> to vector<8x16xf32>
    %485 = vector.shape_cast %482 : vector<8x16xf32> to vector<1x8x16xf32>
    tpu.vector_store %arg6[%c1_160, %c40_161, %c0_162], %485 {strides = array<i32>} : memref<2x56x32xf32, #tpu.memory_space<vmem>>, vector<1x8x16xf32>,
    %c1_163 = arith.constant 1 : index
    %486 = memref.load %arg5[%c1_163] : memref<3xf32, #tpu.memory_space<smem>>
    %487 = vector.broadcast %486 : f32 to vector<8x16xf32>
    %488 = arith.addf %446, %487 : vector<8x16xf32>
    %c1_164 = arith.constant 1 : index
    %c40_165 = arith.constant 40 : index
    %c16_166 = arith.constant 16 : index
    %489 = vector.load %arg6[%c1_164, %c40_165, %c16_166] : memref<2x56x32xf32, #tpu.memory_space<vmem>>, vector<1x8x16xf32>
    %490 = vector.shape_cast %489 : vector<1x8x16xf32> to vector<8x16xf32>
    %491 = vector.shape_cast %488 : vector<8x16xf32> to vector<1x8x16xf32>
    tpu.vector_store %arg6[%c1_164, %c40_165, %c16_166], %491 {strides = array<i32>} : memref<2x56x32xf32, #tpu.memory_space<vmem>>, vector<1x8x16xf32>,
    %c2_167 = arith.constant 2 : index
    %492 = memref.load %arg5[%c2_167] : memref<3xf32, #tpu.memory_space<smem>>
    %493 = vector.broadcast %492 : f32 to vector<8x16xf32>
    %494 = arith.addf %466, %493 : vector<8x16xf32>
    %c1_168 = arith.constant 1 : index
    %c48_169 = arith.constant 48 : index
    %c0_170 = arith.constant 0 : index
    %495 = vector.load %arg6[%c1_168, %c48_169, %c0_170] : memref<2x56x32xf32, #tpu.memory_space<vmem>>, vector<1x8x16xf32>
    %496 = vector.shape_cast %495 : vector<1x8x16xf32> to vector<8x16xf32>
    %497 = vector.shape_cast %494 : vector<8x16xf32> to vector<1x8x16xf32>
    tpu.vector_store %arg6[%c1_168, %c48_169, %c0_170], %497 {strides = array<i32>} : memref<2x56x32xf32, #tpu.memory_space<vmem>>, vector<1x8x16xf32>,
    %c2_171 = arith.constant 2 : index
    %498 = memref.load %arg5[%c2_171] : memref<3xf32, #tpu.memory_space<smem>>
    %499 = vector.broadcast %498 : f32 to vector<8x16xf32>
    %500 = arith.addf %467, %499 : vector<8x16xf32>
    %c1_172 = arith.constant 1 : index
    %c48_173 = arith.constant 48 : index
    %c16_174 = arith.constant 16 : index
    %501 = vector.load %arg6[%c1_172, %c48_173, %c16_174] : memref<2x56x32xf32, #tpu.memory_space<vmem>>, vector<1x8x16xf32>
    %502 = vector.shape_cast %501 : vector<1x8x16xf32> to vector<8x16xf32>
    %503 = vector.shape_cast %500 : vector<8x16xf32> to vector<1x8x16xf32>
    tpu.vector_store %arg6[%c1_172, %c48_173, %c16_174], %503 {strides = array<i32>} : memref<2x56x32xf32, #tpu.memory_space<vmem>>, vector<1x8x16xf32>,
    return
  }
  func.func @transform_0(%arg0: i32) -> (i32, i32, i32) {
    %c0_i32 = arith.constant 0 : i32
    %c0_i32_0 = arith.constant 0 : i32
    %c0_i32_1 = arith.constant 0 : i32
    return %arg0, %c0_i32, %c0_i32_0 : i32, i32, i32
  }
  func.func @transform_1(%arg0: i32) -> (i32, i32, i32) {
    %c0_i32 = arith.constant 0 : i32
    %c0_i32_0 = arith.constant 0 : i32
    %c0_i32_1 = arith.constant 0 : i32
    return %arg0, %c0_i32, %c0_i32_0 : i32, i32, i32
  }
  func.func @transform_2(%arg0: i32) -> (i32, i32) {
    %c0_i32 = arith.constant 0 : i32
    %c0_i32_0 = arith.constant 0 : i32
    %c0_i32_1 = arith.constant 0 : i32
    return %c0_i32, %c0_i32_0 : i32, i32
  }
  func.func @transform_3(%arg0: i32) -> i32 {
    %c0_i32 = arith.constant 0 : i32
    %c0_i32_0 = arith.constant 0 : i32
    return %c0_i32 : i32
  }
  func.func @transform_4(%arg0: i32) -> i32 {
    %c0_i32 = arith.constant 0 : i32
    %c0_i32_0 = arith.constant 0 : i32
    return %c0_i32 : i32
  }
  func.func @transform_5(%arg0: i32) -> (i32, i32, i32) {
    %c0_i32 = arith.constant 0 : i32
    %c0_i32_0 = arith.constant 0 : i32
    %c0_i32_1 = arith.constant 0 : i32
    return %arg0, %c0_i32, %c0_i32_0 : i32, i32, i32
  }
}

</mosaic_0001>

<bundles_post_ra>
// kernel: tpu_custom_call.1
= control target key start
LH: loop header
LB: loop body
LE: loop exit
PB: predicated region body
PF: predicated region fallthrough
CT: control target
= control target key end

     0   :  { %10 = vsyncpa [#allocation5], 0  ;;  %s2454_s0 = inlined_call_operand.vmem [shape: f32[2,32,8], index: 0, kind: input, shape index: {}]   ;;  %s2455_s1 = inlined_call_operand.vmem [shape: f32[2,8,32], index: 1, kind: input, shape index: {}]   ;;  %s2456_s2 = inlined_call_operand.vmem [shape: f32[8,16], index: 2, kind: input, shape index: {}]   ;;  %s2457_s3 = inlined_call_operand.vmem [shape: f32[27], index: 3, kind: input, shape index: {}]   ;;  %s2458_s4 = inlined_call_operand.vmem [shape: f32[3], index: 4, kind: input, shape index: {}]   ;;  %s2459_s5 = inlined_call_operand.vmem [shape: f32[2,56,32], index: 5, kind: output, shape index: {}]  }
   0x1   :  { %s24_s20 = sshll.u32 %s2457_s3, 4  ;;  %s25_s20 = int_to_ptr.vmem [resolvable:$true] %s24_s20 }
   0x2   :  { %11 = vsyncpa [#allocation7], 0  ;;  %s34_s23 = sshll.u32 %s2458_s4, 4  ;;  %s1674_s24 = scalar_lea.vmem %s25_s20, 16  ;;  %s35_s23 = int_to_ptr.vmem [resolvable:$true] %s34_s23 }
   0x3   :  { %p1675_p0 = scmp.ne.s32.totalorder %s25_s20, %s1674_s24  ;;  %p1679_p1 = scmp.lt.s32.totalorder %s25_s20, %s25_s20 }
   0x4   :  { %p1680_p2 = scmp.lt.s32.totalorder %s1674_s24, %s1674_s24 }
   0x6   :  { %p1681_p3 = por %p1680_p2, %p1679_p1 }
   0x8   :  { %p1682_p4 = pnand %p1681_p3, %p1675_p0 }
   0xa   :  { %1685 = shalt.err (!%p1682_p4)
}
   0xb   :  { %s1702_s25 = smov [#allocation4]   ;;  %s1686_s26 = scalar_lea.vmem %s35_s23, 16 }
   0xc   :  { %27 = dma.vmem_to_smem %s25_s20, 16, %s1702_s25, [#allocation5]  }
   0xd   :  { %p1687_p5 = scmp.ne.s32.totalorder %s35_s23, %s1686_s26  ;;  %p1691_p6 = scmp.lt.s32.totalorder %s35_s23, %s35_s23 }
   0xe   :  { %p1692_p7 = scmp.lt.s32.totalorder %s1686_s26, %s1686_s26 }
  0x10   :  { %p1693_p8 = por %p1692_p7, %p1691_p6 }
  0x12   :  { %p1694_p9 = pnand %p1693_p8, %p1687_p5 }
  0x14   :  { %1697 = shalt.err (!%p1694_p9)
}
  0x15   :  { %s1703_s3 = smov [#allocation6]  }
  0x16   :  { %37 = dma.vmem_to_smem %s35_s23, 16, %s1703_s3, [#allocation7]  }
  0x17   :  { %1698 = dma.done.wait [#allocation5], 16  }
  0x18   :  { %1699 = vsyncadd [#allocation5], 4294967280 }
  0x19   :  { %1700 = dma.done.wait [#allocation7], 16  }
  0x1a   :  { %1701 = vsyncadd [#allocation7], 4294967280 }
  0x1b   :  { %44 = sfence }
  0x1c   :  { %v892_v0 = vld [vmem:[%s2455_s1] sm:$0xff]  ;;  %vm54_vm0 = vcmask 64512   ;;  %s1704_s7 = smov 113   ;;  %v1450_v5 = vld [vmem:[%s2455_s1 + $0x8] sm:$0xff]  ;;  %v48_v7 = vld [vmem:[%s2454_s0 + $0x10] sm:$0xff]  ;;  %s1705_s20 = smov 1  }
  0x1d   :  { %v45_v1 = vld [vmem:[%s2456_s2] sm:$0xff]  ;;  %894 = vrot.lane.b32.xlu0 %v892_v0, %s1704_s7  ;;  %v47_v6 = vld [vmem:[%s2454_s0 + $0x8] sm:$0xff]  ;;  %1152 = vrot.lane.b32.xlu1 %v1450_v5, %s1704_s7  ;;  %v62_v10 = vsel %vm54_vm0, %v48_v7, 0  ;;  %vm877_vm1 = vcmask 139264   ;;  %v1706_v58 = vmov 0.0   ;;  %vm880_vm2 = vcmask 7168  }
  0x1e   :  { %v46_v2 = vld [vmem:[%s2454_s0] sm:$0xff]  ;;  %v1755_v3 = vand.u32 4294901760, %v45_v1  ;;  %v59_v9 = vsel %vm54_vm0, %v47_v6, 0  ;;  %v49_v11 = vld [vmem:[%s2454_s0 + $0x18] sm:$0xff]  ;;  %v51_v13 = vld [vmem:[%s2454_s0 + $0x28] sm:$0xff]  ;;  %v1784_v15 = vand.u32 4294901760, %v62_v10 }
  0x1f   :  { %v56_v4 = vsel %vm54_vm0, %v46_v2, 0  ;;  %v50_v12 = vld [vmem:[%s2454_s0 + $0x20] sm:$0xff]  ;;  %v1781_v14 = vand.u32 4294901760, %v59_v9  ;;  %v65_v16 = vsel %vm54_vm0, %v49_v11, 0  ;;  %v52_v18 = vld [vmem:[%s2454_s0 + $0x30] sm:$0xff]  ;;  %v71_v22 = vsel %vm54_vm0, %v51_v13, 0 }
  0x20   :  { %v1767_v8 = vand.u32 4294901760, %v56_v4  ;;  %1584 = vmatprep.subr.mxu0 %v1755_v3  ;;  %1542 = vmatprep.subr.mxu1 %v1755_v3  ;;  %v68_v17 = vsel %vm54_vm0, %v50_v12, 0  ;;  %v1796_v20 = vand.u32 4294901760, %v65_v16  ;;  %v1805_v24 = vsub.f32 %v62_v10, %v1784_v15  ;;  %v53_v43 = vld [vmem:[%s2454_s0 + $0x38] sm:$0xff]  ;;  %878 = vst.msk [vmem:[#allocation2] sm:$0x1] %vm877_vm1, %v1706_v58 }
  0x21   :  { %1585 = vmatpush3.msra.mxu0 %v1755_v3  ;;  %1543 = vmatpush3.msra.mxu1 %v1755_v3  ;;  %v1798_v21 = vand.u32 4294901760, %v68_v17  ;;  %v1802_v23 = vsub.f32 %v59_v9, %v1781_v14  ;;  %v1807_v25 = vand.u32 4294901760, %v71_v22  ;;  %v1810_v26 = vsub.f32 %v45_v1, %v1755_v3  ;;  %879 = vst.msk [vmem:[#allocation3 + $0x8] sm:$0x1] %vm877_vm1, %v1706_v58  ;;  %s1431_s0 = sld [smem:[#allocation4 + $0xa]]  ;;  %s1432_s23 = sld [smem:[#allocation4 + $0xd]] }
  0x22   :  { %v1793_v19 = vsub.f32 %v56_v4, %v1767_v8  ;;  %901 = vrot.lane.b32.xlu0 %v892_v0, %s1705_s20  ;;  %1158 = vrot.lane.b32.xlu1 %v1450_v5, %s1705_s20  ;;  %v1814_v28 = vsub.f32 %v65_v16, %v1796_v20  ;;  %v74_v30 = vsel %vm54_vm0, %v52_v18, 0  ;;  %v167_v32 = vand.u32 4294901760, %v1805_v24  ;;  %881 = vst.msk [vmem:[#allocation2] sm:$0xff] %vm880_vm2, %v1706_v58  ;;  %s1433_s24 = sld [smem:[#allocation4 + $0x10]]  ;;  %s1428_s25 = sld [smem:[#allocation4 + $0x1]] }
  0x23   :  { %v1817_v29 = vsub.f32 %v68_v17, %v1798_v21  ;;  %v157_v31 = vand.u32 4294901760, %v1802_v23  ;;  %v1823_v33 = vsub.f32 %v71_v22, %v1807_v25  ;;  %v228_v34 = vand.u32 4294901760, %v1810_v26  ;;  %888 = vst.msk [vmem:[#allocation3] sm:$0xff] %vm880_vm2, %v1706_v58  ;;  %s1429_s26 = sld [smem:[#allocation4 + $0x4]]  ;;  %s1430_s3 = sld [smem:[#allocation4 + $0x7]] }
  0x24   :  { %v147_v27 = vand.u32 4294901760, %v1793_v19  ;;  %v177_v36 = vand.u32 4294901760, %v1814_v28  ;;  %v1829_v38 = vand.u32 4294901760, %v74_v30  ;;  %v168_v40 = vsub.f32 %v1805_v24, %v167_v32  ;;  %s1440_s4 = sld [smem:[#allocation4 + $0xb]]  ;;  %s1441_s27 = sld [smem:[#allocation4 + $0xe]] }
  0x25   :  { %v187_v37 = vand.u32 4294901760, %v1817_v29  ;;  %v158_v39 = vsub.f32 %v1802_v23, %v157_v31  ;;  %v197_v41 = vand.u32 4294901760, %v1823_v33  ;;  %v229_v42 = vsub.f32 %v1810_v26, %v228_v34  ;;  %1598 = vmatprep.subr.mxu0 %v228_v34  ;;  %s1442_s28 = sld [smem:[#allocation4 + $0x11]]  ;;  %s1434_s29 = sld [smem:[#allocation4 + $0x13]] }
  0x26   :  { %1586 = vmatprep.mubr.f32.mxu0 %v147_v27  ;;  %v148_v35 = vsub.f32 %v1793_v19, %v147_v27  ;;  %v178_v45 = vsub.f32 %v1814_v28, %v177_v36  ;;  %v1841_v47 = vsub.f32 %v74_v30, %v1829_v38  ;;  %v169_v49 = vand.u32 4294901760, %v168_v40  ;;  %s1435_s30 = sld [smem:[#allocation4 + $0x16]]  ;;  %s1436_s6 = sld [smem:[#allocation4 + $0x19]] }
  0x27   :  { %1587 = vmatmul.mubr.f32.vlgmr.msra.gmra.mrb[0].mxu0 %v157_v31  ;;  %v188_v46 = vsub.f32 %v1817_v29, %v187_v37  ;;  %v159_v48 = vand.u32 4294901760, %v158_v39  ;;  %v230_v50 = vand.u32 4294901760, %v229_v42  ;;  %v198_v53 = vsub.f32 %v1823_v33, %v197_v41  ;;  %s1437_s7 = sld [smem:[#allocation4 + $0x2]]  ;;  %s1438_s8 = sld [smem:[#allocation4 + $0x5]] }
  0x28   :  { %v149_v44 = vand.u32 4294901760, %v148_v35  ;;  %1589 = vmatprep.mubr.f32.mxu0 %v167_v32  ;;  %1599 = vmatpush3.msra.mxu0 %v228_v34  ;;  %v179_v51 = vand.u32 4294901760, %v178_v45  ;;  %v207_v52 = vand.u32 4294901760, %v1841_v47  ;;  %v77_v54 = vsel %vm54_vm0, %v53_v43, 0  ;;  %s1439_s9 = sld [smem:[#allocation4 + $0x8]]  ;;  %s1443_s10 = sld [smem:[#allocation4 + $0x14]] }
  0x29   :  { %1612 = vmatprep.subr.mxu0 %v1755_v3  ;;  %v189_v55 = vand.u32 4294901760, %v188_v46  ;;  %v1847_v56 = vand.u32 4294901760, %v77_v54  ;;  %vm882_vm3 = vcmask 0   ;;  %vm884_vm4 = vcmask 146568   ;;  %1556 = vmatprep.subr.mxu1 %v230_v50  ;;  %s1444_s11 = sld [smem:[#allocation4 + $0x17]]  ;;  %s1445_s2 = sld [smem:[#allocation4 + $0x1a]] }
  0x2a   :  { %1544 = vmatprep.mubr.f32.mxu1 %v149_v44  ;;  %v208_v57 = vsub.f32 %v1841_v47, %v207_v52  ;;  %883 = vst.msk [vmem:[#allocation2 + $0x8] sm:$0x1] %vm882_vm3, %v1706_v58  ;;  %vm886_vm5 = vcmask 139400   ;;  %889 = vst.msk [vmem:[#allocation3 + $0x8] sm:$0x1] %vm882_vm3, %v1706_v58  ;;  %v199_v60 = vand.u32 4294901760, %v198_v53  ;;  %v1887_v4 = vstv %s1431_s0 }
  0x2b   :  { %1545 = vmatmul.mubr.f32.vlgmr.msra.gmra.mrb[0].mxu1 %v159_v48  ;;  %1590 = vmatmul.mubr.f32.gmra.mrb[2].mxu0 %v177_v36  ;;  %v216_v59 = vsub.f32 %v77_v54, %v1847_v56  ;;  %885 = vst.msk [vmem:[#allocation2] sm:$0xff] %vm884_vm4, %v1706_v58  ;;  %890 = vst.msk [vmem:[#allocation3] sm:$0xff] %vm884_vm4, %v1706_v58  ;;  %vm897_vm6 = vcmask 138248   ;;  %s1422_s12 = sld [smem:[#allocation4 + $0x9]]  ;;  %s1423_s13 = sld [smem:[#allocation4 + $0xc]]  ;;  %v1889_v5 = vstv %s1432_s23  ;;  %v1891_v6 = vstv %s1433_s24 }
  0x2c   :  { %1547 = vmatprep.mubr.f32.mxu1 %v169_v49  ;;  %1592 = vmatprep.mubr.f32.mxu0 %v187_v37  ;;  %887 = vst.msk [vmem:[#allocation2 + $0x8] sm:$0x1] %vm886_vm5, %v1706_v58  ;;  %891 = vst.msk [vmem:[#allocation3 + $0x8] sm:$0x1] %vm886_vm5, %v1706_v58  ;;  %v209_v62 = vand.u32 4294901760, %v208_v57  ;;  %s1424_s14 = sld [smem:[#allocation4 + $0xf]]  ;;  %v1893_v7 = vstv %s1428_s25  ;;  %v1897_v9 = vstv %s1430_s3  ;;  %v1899_v10 = vstv %s1440_s4 }
  0x2d   :  { %1557 = vmatpush3.msra.mxu1 %v230_v50  ;;  %v217_v61 = vand.u32 4294901760, %v216_v59  ;;  %2462 = vst [vmem:[#allocation10_spill] sm:$0xff] %v1899_v10  ;;  %v1905_v13 = vstv %s1441_s27  ;;  %v1911_v16 = vstv %s1435_s30  ;;  %v1914_v17 = vstv %s1436_s6  ;;  %s1938_s1 = sld [smem:[#allocation4]]  ;;  %s1979_s15 = sld [smem:[#allocation4 + $0x3]] }
  0x2e   :  { %1570 = vmatprep.subr.mxu1 %v1810_v26  ;;  %v1916_v18 = vstv %s1437_s7  ;;  %v1922_v22 = vstv %s1439_s9  ;;  %s1707_s16 = smov 127   ;;  %s2019_s17 = sld [smem:[#allocation4 + $0x6]]  ;;  %vm826_vm7 = vcmask 130048   ;;  %vm847_vm8 = vcmask 261248  }
  0x2f   :  { %1548 = vmatmul.mubr.f32.gmra.mrb[2].mxu1 %v179_v51  ;;  %1593 = vmatmul.mubr.f32.gmra.mrb[4].mxu0 %v197_v41  ;;  %v218_v63 = vsub.f32 %v216_v59, %v217_v61  ;;  %s1708_s18 = smov 126   ;;  %s2053_s19 = sld [smem:[#allocation4 + $0x12]] }
  0x30   :  { %1550 = vmatprep.mubr.f32.mxu1 %v189_v55  ;;  %1595 = vmatprep.mubr.f32.mxu0 %v207_v52  ;;  %s2082_s20 = sld [smem:[#allocation4 + $0x15]]  ;;  %s2105_s21 = sld [smem:[#allocation4 + $0x18]] }
  0x31   :  { %v219_v0 = vand.u32 4294901760, %v218_v63  ;;  %s1447_s22 = sld [smem:[#allocation6 + $0x1]]  ;;  %s1117_s0 = sld [smem:[#allocation6]] }
  0x32   :  { %s1449_s23 = sld [smem:[#allocation6 + $0x2]]  ;;  %s1709_s24 = smov 16  }
  0x33   :  { %1551 = vmatmul.mubr.f32.gmra.mrb[4].mxu1 %v199_v60  ;;  %1596 = vmatmul.mubr.f32.gmra.mrb[6].mxu0 %v217_v61 }
  0x34   :  { %1553 = vmatprep.mubr.f32.mxu1 %v209_v62  ;;  %1600 = vmatprep.mubr.f32.mxu0 %v1767_v8 }
  0x37   :  { %1554 = vmatmul.mubr.f32.gmra.mrb[6].mxu1 %v219_v0  ;;  %1601 = vmatmul.mubr.f32.vlgmr.msra.gmra.mrb[0].mxu0 %v1781_v14  ;;  %v2022_v0 = vstv %s1938_s1 }
  0x38   :  { %1558 = vmatprep.mubr.f32.mxu1 %v1767_v8  ;;  %1603 = vmatprep.mubr.f32.mxu0 %v1784_v15 }
  0x39   :  { %1613 = vmatpush3.msra.mxu0 %v1755_v3 }
  0x3b   :  { %1559 = vmatmul.mubr.f32.vlgmr.msra.gmra.mrb[0].mxu1 %v1781_v14  ;;  %1604 = vmatmul.mubr.f32.gmra.mrb[2].mxu0 %v1796_v20 }
  0x3c   :  { %1561 = vmatprep.mubr.f32.mxu1 %v1784_v15  ;;  %1606 = vmatprep.mubr.f32.mxu0 %v1798_v21 }
  0x3d   :  { %1571 = vmatpush3.msra.mxu1 %v1810_v26 }
  0x3f   :  { %1562 = vmatmul.mubr.f32.gmra.mrb[2].mxu1 %v1796_v20  ;;  %1607 = vmatmul.mubr.f32.gmra.mrb[4].mxu0 %v1807_v25 }
  0x40   :  { %1564 = vmatprep.mubr.f32.mxu1 %v1798_v21  ;;  %1609 = vmatprep.mubr.f32.mxu0 %v1829_v38 }
  0x43   :  { %1565 = vmatmul.mubr.f32.gmra.mrb[4].mxu1 %v1807_v25  ;;  %1610 = vmatmul.mubr.f32.gmra.mrb[6].mxu0 %v1847_v56 }
  0x44   :  { %1567 = vmatprep.mubr.f32.mxu1 %v1829_v38  ;;  %1614 = vmatprep.mubr.f32.mxu0 %v1767_v8  ;;  %v1895_v8 = vstv %s1429_s26 }
  0x47   :  { %1568 = vmatmul.mubr.f32.gmra.mrb[6].mxu1 %v1847_v56  ;;  %1615 = vmatmul.mubr.f32.vlgmr.msra.gmra.mrb[0].mxu0 %v1781_v14  ;;  %v1907_v14 = vstv %s1442_s28 }
  0x48   :  { %1572 = vmatprep.mubr.f32.mxu1 %v1793_v19  ;;  %1617 = vmatprep.mubr.f32.mxu0 %v1784_v15  ;;  %v1909_v15 = vstv %s1434_s29  ;;  %v1918_v19 = vstv %s1438_s8 }
  0x4b   :  { %1573 = vmatmul.mubr.f32.vlgmr.msra.gmra.mrb[0].mxu1 %v1802_v23  ;;  %1618 = vmatmul.mubr.f32.gmra.mrb[2].mxu0 %v1796_v20  ;;  %v1920_v20 = vstv %s1444_s11  ;;  %v1924_v23 = vstv %s1443_s10 }
  0x4c   :  { %1575 = vmatprep.mubr.f32.mxu1 %v1805_v24  ;;  %1620 = vmatprep.mubr.f32.mxu0 %v1798_v21  ;;  %v1926_v24 = vstv %s1445_s2 }
  0x4f   :  { %1576 = vmatmul.mubr.f32.gmra.mrb[2].mxu1 %v1814_v28  ;;  %1621 = vmatmul.mubr.f32.gmra.mrb[4].mxu0 %v1807_v25  ;;  %v1928_v25 = vstv %s1422_s12  ;;  %v1934_v28 = vstv %s1423_s13 }
  0x50   :  { %1578 = vmatprep.mubr.f32.mxu1 %v1817_v29  ;;  %1623 = vmatprep.mubr.f32.mxu0 %v1829_v38  ;;  %v1936_v29 = vstv %s1424_s14 }
  0x53   :  { %1579 = vmatmul.mubr.f32.gmra.mrb[4].mxu1 %v1823_v33  ;;  %1624 = vmatmul.mubr.f32.gmra.mrb[6].mxu0 %v1847_v56 }
  0x54   :  { %1581 = vmatprep.mubr.f32.mxu1 %v1841_v47 }
  0x57   :  { %1582 = vmatmul.mubr.f32.gmra.mrb[6].mxu1 %v216_v59 }
  0x8f   :  { %v895_v1 = vpop.permute.xlu0 %894  ;;  %v1153_v3 = vpop.permute.xlu1 %1152 }
  0x90   :  { %898 = vst.msk [vmem:[#allocation2 + $0x1] sm:$0xff] %vm897_vm6, %v895_v1 }
  0x94   :  { %v902_v2 = vpop.permute.xlu0 %901  ;;  %v1159_v21 = vpop.permute.xlu1 %1158 }
  0x95   :  { %904 = vst.msk [vmem:[#allocation3] sm:$0xff] %vm897_vm6, %v902_v2 }
  0x97   :  { %v1901_v11 = vld [vmem:[#allocation2 + $0x1] sm:$0xff] }
  0x98   :  { %v1903_v12 = vld [vmem:[#allocation2] sm:$0xff]  ;;  %v995_v26 = vmul.f32 %v1889_v5, %v1901_v11  ;;  %v969_v27 = vmul.f32 %v1895_v8, %v1901_v11  ;;  %v1073_v32 = vmul.f32 %v1905_v13, %v1901_v11  ;;  %v1021_v33 = vmul.f32 %v1911_v16, %v1901_v11 }
  0x99   :  { %1155 = vst.msk [vmem:[#allocation2 + $0x1] sm:$0xff] %vm897_vm6, %v1153_v3  ;;  %v1047_v34 = vmul.f32 %v1918_v19, %v1901_v11  ;;  %v1099_v35 = vmul.f32 %v1920_v20, %v1901_v11  ;;  %v1959_v38 = vmul.f32 %v1887_v4, %v1903_v12  ;;  %v1963_v39 = vmul.f32 %v1891_v6, %v1901_v11 }
  0x9a   :  { %v1973_v43 = vmul.f32 %v1893_v7, %v1903_v12  ;;  %v1985_v49 = vmul.f32 %v1897_v9, %v1901_v11  ;;  %v1989_v50 = vmul.f32 %v1899_v10, %v1903_v12  ;;  %v1993_v51 = vmul.f32 %v1907_v14, %v1901_v11 }
  0x9b   :  { %v1999_v58 = vmul.f32 %v1909_v15, %v1903_v12  ;;  %v2003_v59 = vmul.f32 %v1914_v17, %v1901_v11  ;;  %v2007_v60 = vmul.f32 %v1916_v18, %v1903_v12  ;;  %v2017_v63 = vmul.f32 %v1922_v22, %v1901_v11 }
  0x9c   :  { %v1940_v30 = vld [vmem:[#allocation3] sm:$0xff] }
  0x9d   :  { %v1942_v31 = vld [vmem:[#allocation3 + $0x1] sm:$0xff]  ;;  %v994_v36 = vmul.f32 %v1887_v4, %v1940_v30  ;;  %v968_v37 = vmul.f32 %v1893_v7, %v1940_v30  ;;  %v1072_v41 = vmul.f32 %v1899_v10, %v1940_v30  ;;  %v1020_v42 = vmul.f32 %v1909_v15, %v1940_v30 }
  0x9e   :  { %1161 = vst.msk [vmem:[#allocation3] sm:$0xff] %vm897_vm6, %v1159_v21  ;;  %v997_v40 = vmul.f32 %v1891_v6, %v1942_v31  ;;  %v971_v46 = vmul.f32 %v1897_v9, %v1942_v31  ;;  %v1046_v47 = vmul.f32 %v1916_v18, %v1940_v30  ;;  %v1098_v48 = vmul.f32 %v1924_v23, %v1940_v30 }
  0x9f   :  { %v996_v44 = vadd.f32 %v995_v26, %v994_v36  ;;  %v970_v45 = vadd.f32 %v969_v27, %v968_v37  ;;  %v1074_v55 = vadd.f32 %v1073_v32, %v1072_v41  ;;  %v1022_v56 = vadd.f32 %v1021_v33, %v1020_v42 }
  0xa0   :  { %v1995_v52 = vld [vmem:[#allocation2 + $0x1] sm:$0xff]  ;;  %v1048_v57 = vadd.f32 %v1047_v34, %v1046_v47  ;;  %v1075_v61 = vmul.f32 %v1907_v14, %v1942_v31  ;;  %v1023_v62 = vmul.f32 %v1914_v17, %v1942_v31  ;;  %v1049_v2 = vmul.f32 %v1922_v22, %v1942_v31 }
  0xa1   :  { %v998_v53 = vadd.f32 %v997_v40, %v996_v44  ;;  %v972_v54 = vadd.f32 %v971_v46, %v970_v45  ;;  %v1226_v21 = vmul.f32 %v1995_v52, %v1895_v8  ;;  %v1100_v26 = vadd.f32 %v1099_v35, %v1098_v48 }
  0xa2   :  { %v1101_v27 = vmul.f32 %v1926_v24, %v1942_v31  ;;  %v1076_v32 = vadd.f32 %v1075_v61, %v1074_v55  ;;  %v1024_v33 = vadd.f32 %v1023_v62, %v1022_v56  ;;  %v1050_v37 = vadd.f32 %v1049_v2, %v1048_v57 }
  0xa3   :  { %1005 = vrot.lane.b32.xlu1 %v998_v53, %s1707_s16  ;;  %979 = vrot.lane.b32.xlu0 %v972_v54, %s1707_s16  ;;  %v1278_v40 = vmul.f32 %v1995_v52, %v1911_v16  ;;  %v1252_v35 = vmul.f32 %v1995_v52, %v1889_v5  ;;  %v1304_v45 = vmul.f32 %v1995_v52, %v1918_v19  ;;  %v2051_v46 = vstv %s1979_s15 }
  0xa4   :  { %v1102_v47 = vadd.f32 %v1101_v27, %v1100_v26  ;;  %v1330_v54 = vmul.f32 %v1995_v52, %v1905_v13  ;;  %v1356_v61 = vmul.f32 %v1995_v52, %v1920_v20  ;;  %v989_v26 = vmul.f32 %v1889_v5, %v1940_v30 }
  0xa5   :  { %v2024_v1 = vld [vmem:[#allocation3] sm:$0xff] }
  0xa6   :  { %v2028_v3 = vld [vmem:[#allocation3 + $0x1] sm:$0xff]  ;;  %v1225_v34 = vmul.f32 %v2024_v1, %v1893_v7  ;;  %v1277_v36 = vmul.f32 %v2024_v1, %v1909_v15  ;;  %v1251_v41 = vmul.f32 %v2024_v1, %v1887_v4  ;;  %v1303_v48 = vmul.f32 %v2024_v1, %v1916_v18 }
  0xa7   :  { %1083 = vrot.lane.b32.xlu1 %v1076_v32, %s1708_s18  ;;  %1031 = vrot.lane.b32.xlu0 %v1024_v33, %s1707_s16  ;;  %v1228_v44 = vmul.f32 %v2028_v3, %v1897_v9  ;;  %v1329_v53 = vmul.f32 %v2024_v1, %v1899_v10  ;;  %v1355_v57 = vmul.f32 %v2024_v1, %v1924_v23 }
  0xa8   :  { %v1227_v42 = vadd.f32 %v1226_v21, %v1225_v34  ;;  %v1279_v56 = vadd.f32 %v1278_v40, %v1277_v36  ;;  %v1280_v62 = vmul.f32 %v2028_v3, %v1914_v17  ;;  %v1253_v2 = vadd.f32 %v1252_v35, %v1251_v41  ;;  %v2088_v35 = vld [vmem:[#allocation2] sm:$0xff] }
  0xa9   :  { %v1254_v21 = vmul.f32 %v2028_v3, %v1891_v6  ;;  %v1306_v27 = vmul.f32 %v2028_v3, %v1922_v22  ;;  %v963_v32 = vmul.f32 %v1895_v8, %v1940_v30  ;;  %v1067_v33 = vmul.f32 %v1905_v13, %v1940_v30 }
  0xaa   :  { %v1229_v55 = vadd.f32 %v1228_v44, %v1227_v42  ;;  %v2080_v34 = vstv %s2019_s17  ;;  %v1305_v36 = vadd.f32 %v1304_v45, %v1303_v48  ;;  %v1331_v40 = vadd.f32 %v1330_v54, %v1329_v53 }
  0xab   :  { %1057 = vrot.lane.b32.xlu0 %v1050_v37, %s1708_s18  ;;  %2463 = vst [vmem:[#allocation11_spill] sm:$0xff] %v2080_v34  ;;  %v1332_v37 = vmul.f32 %v2028_v3, %v1907_v14  ;;  %v1015_v41 = vmul.f32 %v1911_v16, %v1940_v30  ;;  %v1281_v42 = vadd.f32 %v1280_v62, %v1279_v56 }
  0xac   :  { %1236 = vrot.lane.b32.xlu1 %v1229_v55, %s1707_s16  ;;  %v1357_v44 = vadd.f32 %v1356_v61, %v1355_v57  ;;  %v1358_v55 = vmul.f32 %v2028_v3, %v1926_v24  ;;  %v1220_v10 = vmul.f32 %v2024_v1, %v1895_v8  ;;  %v1255_v34 = vadd.f32 %v1254_v21, %v1253_v2 }
  0xad   :  { %v990_v45 = vadd.f32 %v989_v26, %v1959_v38  ;;  %v1041_v48 = vmul.f32 %v1918_v19, %v1940_v30  ;;  %v1272_v53 = vmul.f32 %v2024_v1, %v1911_v16  ;;  %v964_v54 = vadd.f32 %v963_v32, %v1973_v43 }
  0xae   :  { %v1068_v56 = vadd.f32 %v1067_v33, %v1989_v50  ;;  %v1218_v8 = vmul.f32 %v2088_v35, %v1893_v7  ;;  %v2108_v38 = vstv %s2053_s19  ;;  %v1307_v57 = vadd.f32 %v1306_v27, %v1305_v36 }
  0xaf   :  { %1109 = vrot.lane.b32.xlu0 %v1102_v47, %s1708_s18  ;;  %v1333_v61 = vadd.f32 %v1332_v37, %v1331_v40  ;;  %v1016_v16 = vadd.f32 %v1015_v41, %v1999_v58  ;;  %v1270_v47 = vmul.f32 %v2088_v35, %v1909_v15  ;;  %v1359_v62 = vadd.f32 %v1358_v55, %v1357_v44 }
  0xb0   :  { %1288 = vrot.lane.b32.xlu1 %v1281_v42, %s1707_s16  ;;  %v1221_v2 = vadd.f32 %v1220_v10, %v1218_v8  ;;  %v1042_v43 = vadd.f32 %v1041_v48, %v2007_v60  ;;  %v1093_v50 = vmul.f32 %v1920_v20, %v1940_v30  ;;  %v993_v7 = vadd.f32 %v1963_v39, %v990_v45 }
  0xb1   :  { %v1273_v21 = vadd.f32 %v1272_v53, %v1270_v47  ;;  %v1091_v26 = vmul.f32 %v1924_v23, %v1903_v12  ;;  %v1298_v27 = vmul.f32 %v2024_v1, %v1918_v19  ;;  %v967_v10 = vadd.f32 %v1985_v49, %v964_v54 }
  0xb2   :  { %v1071_v15 = vadd.f32 %v1993_v51, %v1068_v56  ;;  %v1223_v58 = vmul.f32 %v1995_v52, %v1897_v9  ;;  %v2128_v60 = vstv %s2082_s20  ;;  %v1019_v39 = vadd.f32 %v2003_v59, %v1016_v16  ;;  %v2464_v48 = vld [vmem:[#allocation11_spill] sm:$0xff] }
  0xb3   :  { %1262 = vrot.lane.b32.xlu0 %v1255_v34, %s1707_s16  ;;  %v1275_v32 = vmul.f32 %v1995_v52, %v1914_v17  ;;  %v1094_v19 = vadd.f32 %v1093_v50, %v1091_v26  ;;  %v1296_v33 = vmul.f32 %v2088_v35, %v1916_v18  ;;  %v1045_v49 = vadd.f32 %v2017_v63, %v1042_v43 }
  0xb4   :  { %1314 = vrot.lane.b32.xlu1 %v1307_v57, %s1708_s18  ;;  %v1224_v34 = vadd.f32 %v1223_v58, %v1221_v2  ;;  %v1096_v51 = vmul.f32 %v1926_v24, %v1901_v11  ;;  %v1246_v9 = vmul.f32 %v2024_v1, %v1889_v5  ;;  %v2146_v17 = vmul.f32 %v1995_v52, %v1922_v22 }
  0xb5   :  { %v2140_v36 = vadd.f32 %v1275_v32, %v1273_v21  ;;  %v2142_v59 = vadd.f32 %v1298_v27, %v1296_v33  ;;  %v1244_v18 = vmul.f32 %v2088_v35, %v1887_v4  ;;  %v2154_v63 = vmul.f32 %v1995_v52, %v1891_v6 }
  0xb6   :  { %v2158_v5 = vmul.f32 %v2088_v35, %v1924_v23  ;;  %v936_v40 = vmul.f32 %v1928_v25, %v1940_v30  ;;  %v2163_v22 = vstv %s2105_s21  ;;  %v2165_v37 = vadd.f32 %v1096_v51, %v1094_v19 }
  0xb7   :  { %1340 = vrot.lane.b32.xlu0 %v1333_v61, %s1708_s18  ;;  %v2169_v4 = vmul.f32 %v2024_v1, %v1920_v20  ;;  %v937_v41 = vmul.f32 %v1934_v28, %v1901_v11  ;;  %v920_v6 = vmul.f32 %v2022_v0, %v1940_v30  ;;  %v2175_v42 = vadd.f32 %v1246_v9, %v1244_v18 }
  0xb8   :  { %1366 = vrot.lane.b32.xlu1 %v1359_v62, %s1708_s18  ;;  %v2179_v23 = vmul.f32 %v2024_v1, %v1905_v13  ;;  %v921_v44 = vmul.f32 %v2051_v46, %v1901_v11  ;;  %v952_v55 = vmul.f32 %v2108_v38, %v1940_v30  ;;  %v939_v20 = vmul.f32 %v1936_v29, %v1942_v31 }
  0xb9   :  { %v938_v45 = vadd.f32 %v937_v41, %v936_v40  ;;  %v923_v53 = vmul.f32 %v2464_v48, %v1942_v31  ;;  %v953_v54 = vmul.f32 %v2128_v60, %v1901_v11  ;;  %v955_v56 = vmul.f32 %v2163_v22, %v1942_v31 }
  0xba   :  { %v922_v13 = vadd.f32 %v921_v44, %v920_v6  ;;  %v1177_v8 = vmul.f32 %v2024_v1, %v2022_v0  ;;  %v1178_v16 = vmul.f32 %v1995_v52, %v2051_v46  ;;  %v1209_v47 = vmul.f32 %v2024_v1, %v2108_v38 }
  0xbb   :  { %974 = vrot.lane.b32.xlu0 %v967_v10, %s1707_s16  ;;  %v2197_v57 = vadd.f32 %v939_v20, %v938_v45  ;;  %v954_v61 = vadd.f32 %v953_v54, %v952_v55  ;;  %v1180_v2 = vmul.f32 %v2028_v3, %v2464_v48  ;;  %v1210_v31 = vmul.f32 %v1995_v52, %v2128_v60 }
  0xbc   :  { %1000 = vrot.lane.b32.xlu1 %v993_v7, %s1707_s16  ;;  %v2203_v62 = vadd.f32 %v923_v53, %v922_v13  ;;  %v1193_v43 = vmul.f32 %v2024_v1, %v1928_v25  ;;  %v1179_v7 = vadd.f32 %v1178_v16, %v1177_v8  ;;  %v1212_v21 = vmul.f32 %v2028_v3, %v2163_v22  ;;  %v2465_v13 = vld [vmem:[#allocation10_spill] sm:$0xff] }
  0xbd   :  { %v2211_v50 = vadd.f32 %v955_v56, %v954_v61  ;;  %v1194_v26 = vmul.f32 %v1995_v52, %v1934_v28  ;;  %v1211_v27 = vadd.f32 %v1210_v31, %v1209_v47  ;;  %v1196_v10 = vmul.f32 %v2028_v3, %v1936_v29 }
  0xbe   :  { %v931_v58 = vmul.f32 %v1934_v28, %v1940_v30  ;;  %v2223_v32 = vadd.f32 %v1180_v2, %v1179_v7  ;;  %v929_v33 = vmul.f32 %v1928_v25, %v1903_v12  ;;  %v915_v51 = vmul.f32 %v2051_v46, %v1940_v30 }
  0xbf   :  { %1026 = vrot.lane.b32.xlu0 %v1019_v39, %s1707_s16  ;;  %v1195_v19 = vadd.f32 %v1194_v26, %v1193_v43  ;;  %v2229_v9 = vadd.f32 %v1212_v21, %v1211_v27  ;;  %v913_v3 = vmul.f32 %v2022_v0, %v1903_v12  ;;  %v947_v39 = vmul.f32 %v2128_v60, %v1940_v30 }
  0xc0   :  { %1078 = vrot.lane.b32.xlu1 %v1071_v15, %s1708_s18  ;;  %v934_v15 = vmul.f32 %v1936_v29, %v1901_v11  ;;  %v932_v40 = vadd.f32 %v931_v58, %v929_v33  ;;  %v918_v41 = vmul.f32 %v2464_v48, %v1901_v11  ;;  %v945_v6 = vmul.f32 %v2108_v38, %v1903_v12 }
  0xc1   :  { %v2237_v18 = vadd.f32 %v1196_v10, %v1195_v19  ;;  %v916_v44 = vadd.f32 %v915_v51, %v913_v3  ;;  %v1170_v55 = vmul.f32 %v2088_v35, %v2022_v0  ;;  %v1172_v30 = vmul.f32 %v2024_v1, %v2051_v46 }
  0xc2   :  { %v2249_v20 = vadd.f32 %v934_v15, %v932_v40  ;;  %v950_v45 = vmul.f32 %v2163_v22, %v1901_v11  ;;  %v948_v53 = vadd.f32 %v947_v39, %v945_v6  ;;  %v1175_v12 = vmul.f32 %v1995_v52, %v2464_v48 }
  0xc3   :  { %1052 = vrot.lane.b32.xlu0 %v1045_v49, %s1708_s18  ;;  %v2255_v54 = vadd.f32 %v918_v41, %v916_v44  ;;  %v1202_v49 = vmul.f32 %v2088_v35, %v2108_v38  ;;  %v1204_v0 = vmul.f32 %v2024_v1, %v2128_v60  ;;  %v1322_v46 = vmul.f32 %v2088_v35, %v2465_v13 }
  0xc4   :  { %1231 = vrot.lane.b32.xlu1 %v1224_v34, %s1707_s16  ;;  %v1173_v34 = vadd.f32 %v1172_v30, %v1170_v55  ;;  %v2263_v56 = vadd.f32 %v950_v45, %v948_v53  ;;  %v1186_v11 = vmul.f32 %v2088_v35, %v1928_v25  ;;  %v1188_v48 = vmul.f32 %v2024_v1, %v1934_v28 }
  0xc5   :  { %v1205_v60 = vadd.f32 %v1204_v0, %v1202_v49  ;;  %v1207_v8 = vmul.f32 %v1995_v52, %v2163_v22  ;;  %v1302_v61 = vadd.f32 %v2146_v17, %v2142_v59  ;;  %v1191_v25 = vmul.f32 %v1995_v52, %v1936_v29 }
  0xc6   :  { %v2273_v38 = vadd.f32 %v1175_v12, %v1173_v34  ;;  %v1189_v16 = vadd.f32 %v1188_v48, %v1186_v11  ;;  %v1250_v28 = vadd.f32 %v2154_v63, %v2175_v42  ;;  %v1351_v1 = vadd.f32 %v2169_v4, %v2158_v5 }
  0xc7   :  { %1104 = vrot.lane.b32.xlu0 %v2165_v37, %s1708_s18  ;;  %v1325_v35 = vadd.f32 %v2179_v23, %v1322_v46  ;;  %v1353_v59 = vmul.f32 %v1995_v52, %v1926_v24  ;;  %v1327_v29 = vmul.f32 %v1995_v52, %v1907_v14  ;;  %v2299_v42 = vstv %s1447_s22 }
  0xc8   :  { %1283 = vrot.lane.b32.xlu1 %v2140_v36, %s1707_s16  ;;  %v2286_v36 = vadd.f32 %v1207_v8, %v1205_v60  ;;  %v2288_v37 = vadd.f32 %v1191_v25, %v1189_v16  ;;  %v2303_v43 = vstv %s1117_s0  ;;  %v2312_v15 = vstv %s1449_s23 }
  0xc9   :  { %v1354_v17 = vadd.f32 %v1353_v59, %v1351_v1  ;;  %v1328_v63 = vadd.f32 %v1327_v29, %v1325_v35 }
  0xcb   :  { %1257 = vrot.lane.b32.xlu0 %v1250_v28, %s1707_s16 }
  0xcc   :  { %1309 = vrot.lane.b32.xlu1 %v1302_v61, %s1708_s18 }
  0xcf   :  { %1335 = vrot.lane.b32.xlu0 %v1328_v63, %s1708_s18 }
  0xd0   :  { %1361 = vrot.lane.b32.xlu1 %v1354_v17, %s1708_s18 }
 0x115   :  { %v1006_v5 = vpop.permute.xlu1 %1005  ;;  %v980_v22 = vpop.permute.xlu0 %979 }
 0x116   :  { %v1008_v4 = vadd.f32 %v1006_v5, %v2197_v57  ;;  %v982_v52 = vadd.f32 %v980_v22, %v2203_v62 }
 0x119   :  { %v1084_v23 = vpop.permute.xlu1 %1083  ;;  %v1032_v47 = vpop.permute.xlu0 %1031 }
 0x11a   :  { %v1086_v24 = vadd.f32 %v1084_v23, %v1008_v4  ;;  %v1616_v2 = vpop.f32.mrb[0].mxu0  ;;  %v1034_v33 = vadd.f32 %v1032_v47, %v2211_v50 }
 0x11b   :  { %v780_v14 = vpop.f32.mrb[1].mxu0 }
 0x11c   :  { %v1131_v31 = vadd.f32 %v2299_v42, %v1086_v24 }
 0x11d   :  { %v1058_v7 = vpop.permute.xlu0 %1057 }
 0x11e   :  { %v1237_v21 = vpop.permute.xlu1 %1236  ;;  %v1060_v26 = vadd.f32 %v1058_v7, %v982_v52  ;;  %v1574_v27 = vpop.f32.mrb[0].mxu1  ;;  %1133 = vrot.lane.b32.xlu1 %v1131_v31, %s1709_s24 }
 0x11f   :  { %v1619_v57 = vpop.f32.mrb[2].mxu0  ;;  %v1626_v10 = vadd.f32 %v1616_v2, %v1574_v27  ;;  %v413_v58 = vpop.f32.mrb[1].mxu1  ;;  %v1239_v30 = vadd.f32 %v1237_v21, %v2223_v32 }
 0x120   :  { %v792_v19 = vpop.f32.mrb[3].mxu0  ;;  %v1119_v62 = vadd.f32 %v2303_v43, %v1060_v26  ;;  %v1627_v51 = vadd.f32 %v780_v14, %v413_v58 }
 0x121   :  { %828 = vst.msk [vmem:[%s2459_s5 + $0x8] sm:$0xff] %vm826_vm7, %v1626_v10  ;;  %v1110_v3 = vpop.permute.xlu0 %1109 }
 0x122   :  { %v1289_v39 = vpop.permute.xlu1 %1288  ;;  %827 = vst.msk [vmem:[%s2459_s5] sm:$0xff] %vm826_vm7, %v1627_v51  ;;  %v1112_v40 = vadd.f32 %v1110_v3, %v1034_v33  ;;  %v1577_v41 = vpop.f32.mrb[2].mxu1  ;;  %1121 = vrot.lane.b32.xlu0 %v1119_v62, %s1709_s24  ;;  %837 = vrot.lane.b32.xlu1 %v1626_v10, %s1709_s24 }
 0x123   :  { %v1622_v50 = vpop.f32.mrb[4].mxu0  ;;  %v1628_v6 = vadd.f32 %v1619_v57, %v1577_v41  ;;  %v427_v55 = vpop.f32.mrb[3].mxu1  ;;  %v1291_v5 = vadd.f32 %v1289_v39, %v2229_v9 }
 0x124   :  { %v804_v44 = vpop.f32.mrb[5].mxu0  ;;  %v1143_v45 = vadd.f32 %v2312_v15, %v1112_v40  ;;  %v1629_v53 = vadd.f32 %v792_v19, %v427_v55 }
 0x125   :  { %830 = vst.msk [vmem:[%s2459_s5 + $0x18] sm:$0xff] %vm826_vm7, %v1628_v6  ;;  %v1263_v12 = vpop.permute.xlu0 %1262 }
 0x126   :  { %v1315_v34 = vpop.permute.xlu1 %1314  ;;  %829 = vst.msk [vmem:[%s2459_s5 + $0x10] sm:$0xff] %vm826_vm7, %v1629_v53  ;;  %v1580_v0 = vpop.f32.mrb[4].mxu1  ;;  %1145 = vrot.lane.b32.xlu0 %v1143_v45, %s1709_s24  ;;  %v1265_v22 = vadd.f32 %v1263_v12, %v2237_v18 }
 0x127   :  { %v1317_v49 = vadd.f32 %v1315_v34, %v1239_v30  ;;  %v1625_v13 = vpop.f32.mrb[6].mxu0  ;;  %v1630_v32 = vadd.f32 %v1622_v50, %v1580_v0  ;;  %v441_v46 = vpop.f32.mrb[5].mxu1 }
 0x128   :  { %v816_v11 = vpop.f32.mrb[7].mxu0  ;;  %v1631_v60 = vadd.f32 %v804_v44, %v441_v46 }
 0x129   :  { %v1376_v48 = vadd.f32 %v1317_v49, %v2303_v43  ;;  %1413 = vst.msk [vmem:[%s2459_s5 + $0x40] sm:$0xff] %vm826_vm7, %v1630_v32  ;;  %v1341_v8 = vpop.permute.xlu0 %1340 }
 0x12a   :  { %v1367_v61 = vpop.permute.xlu1 %1366  ;;  %1412 = vst.msk [vmem:[%s2459_s5 + $0x38] sm:$0xff] %vm826_vm7, %v1631_v60  ;;  %v1583_v16 = vpop.f32.mrb[6].mxu1  ;;  %835 = vrot.lane.b32.xlu0 %v1627_v51, %s1709_s24  ;;  %v1343_v23 = vadd.f32 %v1341_v8, %v1265_v22 }
 0x12b   :  { %1378 = vrot.lane.b32.xlu1 %v1376_v48, %s1709_s24  ;;  %v1632_v25 = vadd.f32 %v1625_v13, %v1583_v16  ;;  %v455_v28 = vpop.f32.mrb[7].mxu1  ;;  %v1369_v47 = vadd.f32 %v1367_v61, %v1291_v5 }
 0x12c   :  { %v1633_v1 = vadd.f32 %v816_v11, %v455_v28  ;;  %v1388_v18 = vadd.f32 %v1343_v23, %v2299_v42 }
 0x12d   :  { %1415 = vst.msk [vmem:[%s2459_s5 + $0x50] sm:$0xff] %vm826_vm7, %v1632_v25  ;;  %v975_v59 = vpop.permute.xlu0 %974 }
 0x12e   :  { %v1001_v35 = vpop.permute.xlu1 %1000  ;;  %1414 = vst.msk [vmem:[%s2459_s5 + $0x48] sm:$0xff] %vm826_vm7, %v1633_v1  ;;  %839 = vrot.lane.b32.xlu0 %v1629_v53, %s1709_s24  ;;  %v977_v24 = vadd.f32 %v975_v59, %v2255_v54 }
 0x12f   :  { %841 = vrot.lane.b32.xlu1 %v1628_v6, %s1709_s24  ;;  %v1003_v29 = vadd.f32 %v1001_v35, %v2249_v20  ;;  %v1400_v20 = vadd.f32 %v1369_v47, %v2312_v15 }
 0x131   :  { %v1027_v63 = vpop.permute.xlu0 %1026 }
 0x132   :  { %v1079_v17 = vpop.permute.xlu1 %1078  ;;  %861 = vrot.lane.b32.xlu0 %v1631_v60, %s1709_s24  ;;  %v1029_v54 = vadd.f32 %v1027_v63, %v2263_v56 }
 0x133   :  { %v1081_v4 = vadd.f32 %v1079_v17, %v1003_v29  ;;  %863 = vrot.lane.b32.xlu1 %v1630_v32, %s1709_s24 }
 0x135   :  { %v1127_v2 = vadd.f32 %v2299_v42, %v1081_v4  ;;  %v1053_v52 = vpop.permute.xlu0 %1052 }
 0x136   :  { %v1232_v14 = vpop.permute.xlu1 %1231  ;;  %v1055_v9 = vadd.f32 %v1053_v52, %v977_v24  ;;  %865 = vrot.lane.b32.xlu0 %v1633_v1, %s1709_s24 }
 0x137   :  { %1128 = vst.msk [vmem:[%s2459_s5 + $0x28] sm:$0xff] %vm826_vm7, %v1127_v2  ;;  %867 = vrot.lane.b32.xlu1 %v1632_v25, %s1709_s24  ;;  %v1234_v27 = vadd.f32 %v1232_v14, %v2273_v38 }
 0x138   :  { %v1115_v31 = vadd.f32 %v2303_v43, %v1055_v9 }
 0x139   :  { %v1105_v21 = vpop.permute.xlu0 %1104 }
 0x13a   :  { %v1284_v7 = vpop.permute.xlu1 %1283  ;;  %1116 = vst.msk [vmem:[%s2459_s5 + $0x20] sm:$0xff] %vm826_vm7, %v1115_v31  ;;  %v1107_v26 = vadd.f32 %v1105_v21, %v1029_v54  ;;  %1390 = vrot.lane.b32.xlu0 %v1388_v18, %s1709_s24 }
 0x13b   :  { %1402 = vrot.lane.b32.xlu1 %v1400_v20, %s1709_s24  ;;  %v1286_v19 = vadd.f32 %v1284_v7, %v2286_v36 }
 0x13c   :  { %v1139_v57 = vadd.f32 %v2312_v15, %v1107_v26 }
 0x13d   :  { %v1258_v56 = vpop.permute.xlu0 %1257 }
 0x13e   :  { %v1310_v10 = vpop.permute.xlu1 %1309  ;;  %1140 = vst.msk [vmem:[%s2459_s5 + $0x30] sm:$0xff] %vm826_vm7, %v1139_v57  ;;  %v1260_v62 = vadd.f32 %v1258_v56, %v2288_v37 }
 0x13f   :  { %v1312_v58 = vadd.f32 %v1310_v10, %v1234_v27 }
 0x141   :  { %v1372_v33 = vadd.f32 %v1312_v58, %v2303_v43  ;;  %v1336_v3 = vpop.permute.xlu0 %1335 }
 0x142   :  { %v1362_v51 = vpop.permute.xlu1 %1361  ;;  %v1338_v39 = vadd.f32 %v1336_v3, %v1260_v62 }
 0x143   :  { %1478 = vst.msk [vmem:[%s2459_s5 + $0x58] sm:$0xff] %vm826_vm7, %v1372_v33  ;;  %v1364_v38 = vadd.f32 %v1362_v51, %v1286_v19 }
 0x144   :  { %v1384_v41 = vadd.f32 %v1338_v39, %v2299_v42 }
 0x145   :  { %v1396_v40 = vadd.f32 %v1364_v38, %v2312_v15 }
 0x146   :  { %1481 = vst.msk [vmem:[%s2459_s5 + $0x60] sm:$0xff] %vm826_vm7, %v1384_v41 }
 0x147   :  { %1485 = vst.msk [vmem:[%s2459_s5 + $0x68] sm:$0xff] %vm826_vm7, %v1396_v40 }
 0x190   :  { %v1134_v36 = vpop.permute.xlu1 %1133 }
 0x191   :  { %1136 = vst.msk [vmem:[%s2459_s5 + $0x28] sm:$0xff] %vm847_vm8, %v1134_v36 }
 0x194   :  { %v1122_v37 = vpop.permute.xlu0 %1121  ;;  %v838_v43 = vpop.permute.xlu1 %837 }
 0x195   :  { %1124 = vst.msk [vmem:[%s2459_s5 + $0x20] sm:$0xff] %vm847_vm8, %v1122_v37  ;;  %849 = vst.msk [vmem:[%s2459_s5 + $0x8] sm:$0xff] %vm847_vm8, %v838_v43 }
 0x198   :  { %v1146_v42 = vpop.permute.xlu0 %1145 }
 0x199   :  { %1148 = vst.msk [vmem:[%s2459_s5 + $0x30] sm:$0xff] %vm847_vm8, %v1146_v42 }
 0x19c   :  { %v836_v50 = vpop.permute.xlu0 %835 }
 0x19d   :  { %v1379_v15 = vpop.permute.xlu1 %1378  ;;  %848 = vst.msk [vmem:[%s2459_s5] sm:$0xff] %vm847_vm8, %v836_v50 }
 0x19e   :  { %1479 = vst.msk [vmem:[%s2459_s5 + $0x58] sm:$0xff] %vm847_vm8, %v1379_v15 }
 0x1a0   :  { %v840_v44 = vpop.permute.xlu0 %839 }
 0x1a1   :  { %v842_v6 = vpop.permute.xlu1 %841  ;;  %850 = vst.msk [vmem:[%s2459_s5 + $0x10] sm:$0xff] %vm847_vm8, %v840_v44 }
 0x1a2   :  { %851 = vst.msk [vmem:[%s2459_s5 + $0x18] sm:$0xff] %vm847_vm8, %v842_v6 }
 0x1a4   :  { %v862_v30 = vpop.permute.xlu0 %861 }
 0x1a5   :  { %v864_v55 = vpop.permute.xlu1 %863  ;;  %1416 = vst.msk [vmem:[%s2459_s5 + $0x38] sm:$0xff] %vm847_vm8, %v862_v30 }
 0x1a6   :  { %1417 = vst.msk [vmem:[%s2459_s5 + $0x40] sm:$0xff] %vm847_vm8, %v864_v55 }
 0x1a8   :  { %v866_v53 = vpop.permute.xlu0 %865 }
 0x1a9   :  { %v868_v45 = vpop.permute.xlu1 %867  ;;  %1418 = vst.msk [vmem:[%s2459_s5 + $0x48] sm:$0xff] %vm847_vm8, %v866_v53 }
 0x1aa   :  { %1419 = vst.msk [vmem:[%s2459_s5 + $0x50] sm:$0xff] %vm847_vm8, %v868_v45 }
 0x1ac   :  { %v1391_v34 = vpop.permute.xlu0 %1390 }
 0x1ad   :  { %v1403_v12 = vpop.permute.xlu1 %1402  ;;  %1483 = vst.msk [vmem:[%s2459_s5 + $0x60] sm:$0xff] %vm847_vm8, %v1391_v34 }
 0x1ae   :  { %1487 = vst.msk [vmem:[%s2459_s5 + $0x68] sm:$0xff] %vm847_vm8, %v1403_v12 }
 0x1af   :  { %1410 = vsyncpa [#allocation5], 1 }
 0x1b0   :  { %1411 = vsyncpa [#allocation7], 1 }

</bundles_post_ra>
